<compile_context>
chip_gen: v7x
topology: tpu7x:2x2x1
jax: 0.10.0
libtpu: 0.0.40
codegen_flags: <defaults>
</compile_context>

<pallas_src>
import math
from functools import partial

import jax
import jax.numpy as jnp
from jax.experimental import pallas as pl
from jax.experimental.pallas import tpu as pltpu


def attn_block_kernel(x_ref, lnbo_ref, bqkv_ref, wqkv_ref, wo_ref,
                      out_ref, attn_ref, *, num_heads, ln_eps):
    """One grid step == G batch elements.

    x_ref    : (G, S, D)  f32   block-input activations
    lnbo_ref : (3, D)     f32   rows = [ln_gamma, ln_beta, out_proj_bias]
    bqkv_ref : (1, 3D)    f32   fused qkv bias (q part pre-scaled by 1/sqrt(hd))
    wqkv_ref : (D, 3D)    bf16  fused qkv weight (q columns pre-scaled)
    wo_ref   : (D, D)     bf16  output projection weight (pre-transposed)
    out_ref  : (G, S, D)  f32
    attn_ref : (G, S, D)  bf16  VMEM scratch slab for per-head outputs
    """
    G, S, D = x_ref.shape
    hd = D // num_heads

    # ---- LayerNorm (biased variance), affine -- all f32 ----
    x2 = x_ref[...].reshape(G * S, D)          # not kept live; residual re-reads x_ref
    gamma = lnbo_ref[0:1, :]
    beta = lnbo_ref[1:2, :]
    mu = jnp.mean(x2, axis=-1, keepdims=True)
    var = jnp.mean((x2 - mu) ** 2, axis=-1, keepdims=True)
    xn = (x2 - mu) * jax.lax.rsqrt(var + ln_eps)
    xn = xn * gamma + beta                     # (G*S, D)

    # ---- Fused QKV projection: one (G*S, D) @ (D, 3D) MXU op, f32 accum ----
    qkv = jnp.dot(xn.astype(jnp.bfloat16), wqkv_ref[...],
                  preferred_element_type=jnp.float32) + bqkv_ref[...]
    qkv = qkv.astype(jnp.bfloat16).reshape(G, S, 3 * D)
    q = qkv[:, :, :D]                          # 1/sqrt(hd) scale already folded in
    k = qkv[:, :, D:2 * D]
    v = qkv[:, :, 2 * D:]

    # ---- Per-head attention (static loop, static slices; one score slab per iter) ----
    for h in range(num_heads):
        lo, hi = h * hd, (h + 1) * hd
        qh = q[:, :, lo:hi]                    # (G, S, hd) bf16
        kh = k[:, :, lo:hi]
        vh = v[:, :, lo:hi]
        # scores: contract the head dim of q and k directly (no transpose).
        s = jax.lax.dot_general(qh, kh, (((2,), (2,)), ((0,), (0,))),
                                preferred_element_type=jnp.float32)   # (G, S, S) f32
        p = jnp.exp(s - jnp.max(s, axis=-1, keepdims=True))
        denom = jnp.sum(p, axis=-1, keepdims=True)                    # (G, S, 1) f32
        # attention_dropout: eval mode => identity
        oh = jax.lax.dot_general(p.astype(jnp.bfloat16), vh,
                                 (((2,), (1,)), ((0,), (0,))),
                                 preferred_element_type=jnp.float32)  # (G, S, hd)
        # post-matmul normalization: hd-wide pass instead of S-wide; EUP reciprocal.
        oh = oh * pl.reciprocal(denom, approx=True)
        attn_ref[:, :, lo:hi] = oh.astype(attn_ref.dtype)

    # ---- Output projection + bias + residual (re-read x_ref; it is already in VMEM) ----
    attn = attn_ref[...].reshape(G * S, D)                            # bf16
    bo = lnbo_ref[2:3, :]
    y = jnp.dot(attn, wo_ref[...], preferred_element_type=jnp.float32) + bo
    # dropout: eval mode => identity
    out_ref[...] = y.reshape(G, S, D) + x_ref[...]


def _vmem_estimate_bytes(g, s, d, num_heads, const_buffers=2):
    """Per-grid-step VMEM working-set estimate (conservative, incl. double buffering)."""
    f32, bf16 = 4, 2
    rows = g * s
    hd = d // num_heads
    io = 2 * 2 * rows * d * f32                     # x + out blocks, double-buffered
    attn_slab = rows * d * bf16                     # bf16 scratch slab
    ln = 2 * rows * d * f32                         # x value + normalized xn (f32)
    qkv = rows * 3 * d * (f32 + bf16)               # f32 matmul result + bf16 copy
    scores = g * s * s * (2 * f32 + bf16)           # two live f32 score slabs + bf16 p
    head_out = rows * hd * f32                      # per-head PV output
    y = rows * d * f32                              # out-projection f32 result
    consts = const_buffers * ((d * 3 * d + d * d) * bf16 + (3 * d + 3 * d) * f32)
    return io + attn_slab + ln + qkv + scores + head_out + y + consts + (2 << 20)


def _vmem_capacity_bytes():
    """Physical VMEM per TensorCore; conservative v7x-class default if unknown."""
    try:
        info = pltpu.get_tpu_info()
        for attr in ("vmem_capacity_bytes", "vmem_size_bytes", "vmem_bytes"):
            v = getattr(info, attr, None)
            if v:
                return int(v)
    except Exception:
        pass
    return 64 * 1024 * 1024


def _pick_group(B, S, D, num_heads, budget_bytes, max_group=64, min_grid=1):
    """Largest divisor of B whose working set fits the budget (and keeps grid >= min_grid)."""
    best = 1
    for g in range(1, min(B, max_group) + 1):
        if B % g != 0:
            continue
        if min_grid > 1 and (B // g) < min_grid:
            continue
        if _vmem_estimate_bytes(g, S, D, num_heads, const_buffers=2) <= budget_bytes:
            best = g
    return best


def _const_spec(shape, single_buffer):
    index_map = lambda b: (0,) * len(shape)
    if single_buffer:
        # Constant index_map => never re-fetched; one buffer is enough.
        return pl.BlockSpec(shape, index_map, pipeline_mode=pl.Buffered(1))
    return pl.BlockSpec(shape, index_map)


def _build_pallas_call(B, S, D, G, num_heads, ln_eps, vmem_limit, single_buffer_consts):
    kernel = partial(attn_block_kernel, num_heads=num_heads, ln_eps=ln_eps)
    const = partial(_const_spec, single_buffer=single_buffer_consts)
    return pl.pallas_call(
        kernel,
        out_shape=jax.ShapeDtypeStruct((B, S, D), jnp.float32),
        grid=(B // G,),
        in_specs=[
            pl.BlockSpec((G, S, D), lambda b: (b, 0, 0)),    # x: G batches per step
            const((3, D)),                                   # [gamma, beta, out_bias]
            const((1, 3 * D)),                               # fused qkv bias
            const((D, 3 * D)),                               # fused qkv weight (bf16)
            const((D, D)),                                   # output projection (bf16)
        ],
        out_specs=pl.BlockSpec((G, S, D), lambda b: (b, 0, 0)),
        scratch_shapes=[pltpu.VMEM((G, S, D), jnp.bfloat16)],
        compiler_params=pltpu.CompilerParams(
            dimension_semantics=("parallel",),
            vmem_limit_bytes=int(vmem_limit)),
    )


def prepare_encoder_attention_params(params, num_heads):
    """One-time weight preprocessing (hoisted out of the per-call path).

    Builds the fused x@W-form QKV weight/bias with the 1/sqrt(hd) attention scale
    folded into the Q columns/bias, the pre-transposed output projection, and the
    stacked [gamma, beta, out_bias] slab. Call once at parameter-load time.
    """
    D = params["ln_gamma"].shape[0]
    assert D % num_heads == 0
    hd = D // num_heads
    scale = 1.0 / math.sqrt(hd)
    w_in = params["in_proj_weight"]                  # (3D, D): rows = [Wq; Wk; Wv]
    b_in = params["in_proj_bias"]                    # (3D,)
    wqkv = jnp.concatenate(
        [w_in[:D].T * scale, w_in[D:2 * D].T, w_in[2 * D:].T], axis=1)
    bqkv = jnp.concatenate([b_in[:D] * scale, b_in[D:2 * D], b_in[2 * D:]])
    return {
        "wqkv": wqkv.astype(jnp.bfloat16),                             # (D, 3D)
        "bqkv": bqkv.reshape(1, 3 * D).astype(jnp.float32),            # (1, 3D)
        "wo": params["out_proj_weight"].T.astype(jnp.bfloat16),        # (D, D)
        "lnbo": jnp.stack([params["ln_gamma"], params["ln_beta"],
                           params["out_proj_bias"]]).astype(jnp.float32),  # (3, D)
    }


def encoder_attention_block(x, prepared, num_heads, *, ln_eps=1e-6, group=None):
    """x: (B, S, D) float32.  prepared: output of prepare_encoder_attention_params.

    NOTE: ln_eps defaults to 1e-6 (torchvision ViT norm_layer); plain nn.LayerNorm
    uses 1e-5 -- pass it explicitly if that is the reference config.
    Real configs should use D % 128 == 0 (and hd a multiple of 128 where possible)
    for lane-dense stores; the toy path below tolerates smaller D.
    """
    B, S, D = x.shape
    assert D % num_heads == 0

    # Generation-aware budgets: 128 MiB VMEM (v5e/v6e) => large tiles; 64 MiB
    # (v7x-class, 2 TCs) => conservative limit and keep grid length >= 2 so both
    # TensorCores get work under dimension_semantics=("parallel",).
    cap = _vmem_capacity_bytes()
    if cap >= 96 * 1024 * 1024:
        budget, limit_cap, min_grid = 80 * 1024 * 1024, 100 * 1024 * 1024, 1
    else:
        budget, limit_cap = 30 * 1024 * 1024, 44 * 1024 * 1024
        min_grid = 2 if B >= 2 else 1

    G = group if group is not None else _pick_group(B, S, D, num_heads, budget,
                                                    min_grid=min_grid)
    assert B % G == 0
    est = _vmem_estimate_bytes(G, S, D, num_heads)
    vmem_limit = int(min(limit_cap, max(32 * 1024 * 1024, (3 * est) // 2)))

    args = (x, prepared["lnbo"], prepared["bqkv"], prepared["wqkv"], prepared["wo"])
    try:
        # Preferred path: single-buffered constant operands (saves ~(3D^2+D^2)*2 bytes).
        fn = _build_pallas_call(B, S, D, G, num_heads, ln_eps, vmem_limit, True)
        return fn(*args)
    except Exception:
        # Fallback: this JAX/Mosaic build does not accept pipeline_mode on
        # pallas_call BlockSpecs -- keep default double-buffered constants.
        fn = _build_pallas_call(B, S, D, G, num_heads, ln_eps, vmem_limit, False)
        return fn(*args)


def init_params(key, hidden_dim):
    """Deterministic synthetic parameters mirroring nn.LayerNorm + nn.MultiheadAttention."""
    D = hidden_dim
    k1, k2, k3, k4 = jax.random.split(key, 4)
    bound = 1.0 / math.sqrt(D)
    return {
        "ln_gamma": jnp.ones((D,), jnp.float32),
        "ln_beta": jnp.zeros((D,), jnp.float32),
        "in_proj_weight": jax.random.uniform(k1, (3 * D, D), jnp.float32, -bound, bound),
        "in_proj_bias": jax.random.uniform(k2, (3 * D,), jnp.float32, -bound, bound),
        "out_proj_weight": jax.random.uniform(k3, (D, D), jnp.float32, -bound, bound),
        "out_proj_bias": jax.random.uniform(k4, (D,), jnp.float32, -bound, bound),
    }


if __name__ == "__main__":
    B, S, D, H = 2, 8, 32, 4
    key = jax.random.PRNGKey(0)
    kx, kp = jax.random.split(key)
    x = jax.random.normal(kx, (B, S, D), jnp.float32)
    params = init_params(kp, D)

    # Weight preprocessing hoisted out of the forward call (done once).
    prepared = prepare_encoder_attention_params(params, H)
    prepared = {k: jax.block_until_ready(v) for k, v in prepared.items()}

    out = encoder_attention_block(x, prepared, num_heads=H)
    jax.block_until_ready(out)
    assert out.shape == (B, S, D) and out.dtype == jnp.float32
    assert bool(jnp.all(jnp.isfinite(out)))
    print("KERNEL_OK")
</pallas_src>

<mosaic_0001>
module attributes {stable_mosaic.version = 11 : i64} {
  func.func @attn_block_kernel(%arg0: i32, %arg1: memref<1x8x32xf32, #tpu.memory_space<vmem>>, %arg2: memref<3x32xf32, #tpu.memory_space<vmem>>, %arg3: memref<1x96xf32, #tpu.memory_space<vmem>>, %arg4: memref<32x96xbf16, #tpu.memory_space<vmem>>, %arg5: memref<32x32xbf16, #tpu.memory_space<vmem>>, %arg6: memref<1x8x32xf32, #tpu.memory_space<vmem>>, %arg7: memref<1x8x32xbf16, #tpu.memory_space<vmem>>) attributes {dimension_semantics = [#tpu.dimension_semantics<parallel>], iteration_bounds = array<i64: 2>, scalar_prefetch = 0 : i64, scratch_operands = 1 : i64, tpu.core_type = #tpu.core_type<tc>, window_params = [{transform_indices = @transform_0, window_bounds = array<i64: 1, 8, 32>}, {pipeline_mode = #tpu.pipeline_mode<synchronous>, transform_indices = @transform_1, window_bounds = array<i64: 3, 32>}, {pipeline_mode = #tpu.pipeline_mode<synchronous>, transform_indices = @transform_2, window_bounds = array<i64: 1, 96>}, {pipeline_mode = #tpu.pipeline_mode<synchronous>, transform_indices = @transform_3, window_bounds = array<i64: 32, 96>}, {pipeline_mode = #tpu.pipeline_mode<synchronous>, transform_indices = @transform_4, window_bounds = array<i64: 32, 32>}, {transform_indices = @transform_5, window_bounds = array<i64: 1, 8, 32>}]} {
    %c0 = arith.constant 0 : index
    %c0_0 = arith.constant 0 : index
    %c0_1 = arith.constant 0 : index
    %0 = vector.load %arg1[%c0, %c0_0, %c0_1] : memref<1x8x32xf32, #tpu.memory_space<vmem>>, vector<1x8x32xf32>
    %1 = vector.shape_cast %0 : vector<1x8x32xf32> to vector<8x32xf32>
    %c0_2 = arith.constant 0 : index
    %c0_3 = arith.constant 0 : index
    %2 = vector.load %arg2[%c0_2, %c0_3] : memref<3x32xf32, #tpu.memory_space<vmem>>, vector<1x32xf32>
    %c1 = arith.constant 1 : index
    %c0_4 = arith.constant 0 : index
    %3 = vector.load %arg2[%c1, %c0_4] : memref<3x32xf32, #tpu.memory_space<vmem>>, vector<1x32xf32>
    %cst = arith.constant dense<0.000000e+00> : vector<8xf32>
    %4 = vector.multi_reduction <add>, %1, %cst [1] : vector<8x32xf32> to vector<8xf32>
    %5 = vector.shape_cast %4 : vector<8xf32> to vector<8x1xf32>
    %cst_5 = arith.constant 3.200000e+01 : f32
    %6 = vector.broadcast %cst_5 : f32 to vector<8x1xf32>
    %7 = arith.divf %5, %6 : vector<8x1xf32>
    %8 = vector.broadcast %7 : vector<8x1xf32> to vector<8x32xf32>
    %9 = arith.subf %1, %8 : vector<8x32xf32>
    %10 = arith.mulf %9, %9 : vector<8x32xf32>
    %cst_6 = arith.constant dense<0.000000e+00> : vector<8xf32>
    %11 = vector.multi_reduction <add>, %10, %cst_6 [1] : vector<8x32xf32> to vector<8xf32>
    %12 = vector.shape_cast %11 : vector<8xf32> to vector<8x1xf32>
    %cst_7 = arith.constant 3.200000e+01 : f32
    %13 = vector.broadcast %cst_7 : f32 to vector<8x1xf32>
    %14 = arith.divf %12, %13 : vector<8x1xf32>
    %15 = vector.broadcast %7 : vector<8x1xf32> to vector<8x32xf32>
    %16 = arith.subf %1, %15 : vector<8x32xf32>
    %cst_8 = arith.constant 9.99999997E-7 : f32
    %17 = vector.broadcast %cst_8 : f32 to vector<8x1xf32>
    %18 = arith.addf %14, %17 : vector<8x1xf32>
    %19 = math.rsqrt %18 : vector<8x1xf32>
    %20 = vector.broadcast %19 : vector<8x1xf32> to vector<8x32xf32>
    %21 = arith.mulf %16, %20 : vector<8x32xf32>
    %22 = vector.broadcast %2 : vector<1x32xf32> to vector<8x32xf32>
    %23 = arith.mulf %21, %22 : vector<8x32xf32>
    %24 = vector.broadcast %3 : vector<1x32xf32> to vector<8x32xf32>
    %25 = arith.addf %23, %24 : vector<8x32xf32>
    %26 = arith.truncf %25 : vector<8x32xf32> to vector<8x32xbf16>
    %c0_9 = arith.constant 0 : index
    %c0_10 = arith.constant 0 : index
    %27 = vector.load %arg4[%c0_9, %c0_10] : memref<32x96xbf16, #tpu.memory_space<vmem>>, vector<32x96xbf16>
    %cst_11 = arith.constant dense<0.000000e+00> : vector<8x96xf32>
    %28 = tpu.matmul %26, %27, %cst_11 {dimension_numbers = #tpu.dot_dimension_numbers<[1], [0], [0], [1], [0, 0, 1, 1], [], []>} : vector<8x32xbf16>, vector<32x96xbf16>, vector<8x96xf32> -> vector<8x96xf32>
    %c0_12 = arith.constant 0 : index
    %c0_13 = arith.constant 0 : index
    %29 = vector.load %arg3[%c0_12, %c0_13] : memref<1x96xf32, #tpu.memory_space<vmem>>, vector<1x96xf32>
    %30 = vector.broadcast %29 : vector<1x96xf32> to vector<8x96xf32>
    %31 = arith.addf %28, %30 : vector<8x96xf32>
    %32 = arith.truncf %31 : vector<8x96xf32> to vector<8x96xbf16>
    %33 = vector.shape_cast %32 : vector<8x96xbf16> to vector<1x8x96xbf16>
    %34 = vector.extract_strided_slice %33 {offsets = [0, 0, 0], sizes = [1, 8, 32], strides = [1, 1, 1]} : vector<1x8x96xbf16> to vector<1x8x32xbf16>
    %35 = vector.extract_strided_slice %33 {offsets = [0, 0, 32], sizes = [1, 8, 32], strides = [1, 1, 1]} : vector<1x8x96xbf16> to vector<1x8x32xbf16>
    %36 = vector.extract_strided_slice %33 {offsets = [0, 0, 64], sizes = [1, 8, 32], strides = [1, 1, 1]} : vector<1x8x96xbf16> to vector<1x8x32xbf16>
    %37 = vector.extract_strided_slice %34 {offsets = [0, 0, 0], sizes = [1, 8, 8], strides = [1, 1, 1]} : vector<1x8x32xbf16> to vector<1x8x8xbf16>
    %38 = vector.extract_strided_slice %35 {offsets = [0, 0, 0], sizes = [1, 8, 8], strides = [1, 1, 1]} : vector<1x8x32xbf16> to vector<1x8x8xbf16>
    %39 = vector.extract_strided_slice %36 {offsets = [0, 0, 0], sizes = [1, 8, 8], strides = [1, 1, 1]} : vector<1x8x32xbf16> to vector<1x8x8xbf16>
    %cst_14 = arith.constant dense<0.000000e+00> : vector<1x8x8xf32>
    %40 = tpu.matmul %37, %38, %cst_14 {dimension_numbers = #tpu.dot_dimension_numbers<[2], [2], [1], [1], [0, 0, 0, 1, 1, 1], [0], [0]>} : vector<1x8x8xbf16>, vector<1x8x8xbf16>, vector<1x8x8xf32> -> vector<1x8x8xf32>
    %cst_15 = arith.constant dense<0xFF800000> : vector<1x8xf32>
    %41 = vector.multi_reduction <maximumf>, %40, %cst_15 [2] : vector<1x8x8xf32> to vector<1x8xf32>
    %42 = vector.shape_cast %41 : vector<1x8xf32> to vector<1x8x1xf32>
    %43 = vector.broadcast %42 : vector<1x8x1xf32> to vector<1x8x8xf32>
    %44 = arith.subf %40, %43 : vector<1x8x8xf32>
    %45 = math.exp %44 : vector<1x8x8xf32>
    %cst_16 = arith.constant dense<0.000000e+00> : vector<1x8xf32>
    %46 = vector.multi_reduction <add>, %45, %cst_16 [2] : vector<1x8x8xf32> to vector<1x8xf32>
    %47 = vector.shape_cast %46 : vector<1x8xf32> to vector<1x8x1xf32>
    %48 = arith.truncf %45 : vector<1x8x8xf32> to vector<1x8x8xbf16>
    %cst_17 = arith.constant dense<0.000000e+00> : vector<1x8x8xf32>
    %49 = tpu.matmul %48, %39, %cst_17 {dimension_numbers = #tpu.dot_dimension_numbers<[2], [1], [1], [2], [0, 0, 0, 1, 1, 2], [0], [0]>} : vector<1x8x8xbf16>, vector<1x8x8xbf16>, vector<1x8x8xf32> -> vector<1x8x8xf32>
    %50 = tpu.reciprocal %47 {approx = true} : vector<1x8x1xf32> -> vector<1x8x1xf32>
    %51 = vector.broadcast %50 : vector<1x8x1xf32> to vector<1x8x8xf32>
    %52 = arith.mulf %49, %51 : vector<1x8x8xf32>
    %53 = arith.truncf %52 : vector<1x8x8xf32> to vector<1x8x8xbf16>
    %c0_18 = arith.constant 0 : index
    %c0_19 = arith.constant 0 : index
    %c0_20 = arith.constant 0 : index
    %54 = vector.load %arg7[%c0_18, %c0_19, %c0_20] : memref<1x8x32xbf16, #tpu.memory_space<vmem>>, vector<1x8x8xbf16>
    tpu.vector_store %arg7[%c0_18, %c0_19, %c0_20], %53 {strides = array<i32>} : memref<1x8x32xbf16, #tpu.memory_space<vmem>>, vector<1x8x8xbf16>,
    %55 = vector.extract_strided_slice %34 {offsets = [0, 0, 8], sizes = [1, 8, 8], strides = [1, 1, 1]} : vector<1x8x32xbf16> to vector<1x8x8xbf16>
    %56 = vector.extract_strided_slice %35 {offsets = [0, 0, 8], sizes = [1, 8, 8], strides = [1, 1, 1]} : vector<1x8x32xbf16> to vector<1x8x8xbf16>
    %57 = vector.extract_strided_slice %36 {offsets = [0, 0, 8], sizes = [1, 8, 8], strides = [1, 1, 1]} : vector<1x8x32xbf16> to vector<1x8x8xbf16>
    %cst_21 = arith.constant dense<0.000000e+00> : vector<1x8x8xf32>
    %58 = tpu.matmul %55, %56, %cst_21 {dimension_numbers = #tpu.dot_dimension_numbers<[2], [2], [1], [1], [0, 0, 0, 1, 1, 1], [0], [0]>} : vector<1x8x8xbf16>, vector<1x8x8xbf16>, vector<1x8x8xf32> -> vector<1x8x8xf32>
    %cst_22 = arith.constant dense<0xFF800000> : vector<1x8xf32>
    %59 = vector.multi_reduction <maximumf>, %58, %cst_22 [2] : vector<1x8x8xf32> to vector<1x8xf32>
    %60 = vector.shape_cast %59 : vector<1x8xf32> to vector<1x8x1xf32>
    %61 = vector.broadcast %60 : vector<1x8x1xf32> to vector<1x8x8xf32>
    %62 = arith.subf %58, %61 : vector<1x8x8xf32>
    %63 = math.exp %62 : vector<1x8x8xf32>
    %cst_23 = arith.constant dense<0.000000e+00> : vector<1x8xf32>
    %64 = vector.multi_reduction <add>, %63, %cst_23 [2] : vector<1x8x8xf32> to vector<1x8xf32>
    %65 = vector.shape_cast %64 : vector<1x8xf32> to vector<1x8x1xf32>
    %66 = arith.truncf %63 : vector<1x8x8xf32> to vector<1x8x8xbf16>
    %cst_24 = arith.constant dense<0.000000e+00> : vector<1x8x8xf32>
    %67 = tpu.matmul %66, %57, %cst_24 {dimension_numbers = #tpu.dot_dimension_numbers<[2], [1], [1], [2], [0, 0, 0, 1, 1, 2], [0], [0]>} : vector<1x8x8xbf16>, vector<1x8x8xbf16>, vector<1x8x8xf32> -> vector<1x8x8xf32>
    %68 = tpu.reciprocal %65 {approx = true} : vector<1x8x1xf32> -> vector<1x8x1xf32>
    %69 = vector.broadcast %68 : vector<1x8x1xf32> to vector<1x8x8xf32>
    %70 = arith.mulf %67, %69 : vector<1x8x8xf32>
    %71 = arith.truncf %70 : vector<1x8x8xf32> to vector<1x8x8xbf16>
    %c0_25 = arith.constant 0 : index
    %c0_26 = arith.constant 0 : index
    %c8 = arith.constant 8 : index
    %72 = vector.load %arg7[%c0_25, %c0_26, %c8] : memref<1x8x32xbf16, #tpu.memory_space<vmem>>, vector<1x8x8xbf16>
    tpu.vector_store %arg7[%c0_25, %c0_26, %c8], %71 {strides = array<i32>} : memref<1x8x32xbf16, #tpu.memory_space<vmem>>, vector<1x8x8xbf16>,
    %73 = vector.extract_strided_slice %34 {offsets = [0, 0, 16], sizes = [1, 8, 8], strides = [1, 1, 1]} : vector<1x8x32xbf16> to vector<1x8x8xbf16>
    %74 = vector.extract_strided_slice %35 {offsets = [0, 0, 16], sizes = [1, 8, 8], strides = [1, 1, 1]} : vector<1x8x32xbf16> to vector<1x8x8xbf16>
    %75 = vector.extract_strided_slice %36 {offsets = [0, 0, 16], sizes = [1, 8, 8], strides = [1, 1, 1]} : vector<1x8x32xbf16> to vector<1x8x8xbf16>
    %cst_27 = arith.constant dense<0.000000e+00> : vector<1x8x8xf32>
    %76 = tpu.matmul %73, %74, %cst_27 {dimension_numbers = #tpu.dot_dimension_numbers<[2], [2], [1], [1], [0, 0, 0, 1, 1, 1], [0], [0]>} : vector<1x8x8xbf16>, vector<1x8x8xbf16>, vector<1x8x8xf32> -> vector<1x8x8xf32>
    %cst_28 = arith.constant dense<0xFF800000> : vector<1x8xf32>
    %77 = vector.multi_reduction <maximumf>, %76, %cst_28 [2] : vector<1x8x8xf32> to vector<1x8xf32>
    %78 = vector.shape_cast %77 : vector<1x8xf32> to vector<1x8x1xf32>
    %79 = vector.broadcast %78 : vector<1x8x1xf32> to vector<1x8x8xf32>
    %80 = arith.subf %76, %79 : vector<1x8x8xf32>
    %81 = math.exp %80 : vector<1x8x8xf32>
    %cst_29 = arith.constant dense<0.000000e+00> : vector<1x8xf32>
    %82 = vector.multi_reduction <add>, %81, %cst_29 [2] : vector<1x8x8xf32> to vector<1x8xf32>
    %83 = vector.shape_cast %82 : vector<1x8xf32> to vector<1x8x1xf32>
    %84 = arith.truncf %81 : vector<1x8x8xf32> to vector<1x8x8xbf16>
    %cst_30 = arith.constant dense<0.000000e+00> : vector<1x8x8xf32>
    %85 = tpu.matmul %84, %75, %cst_30 {dimension_numbers = #tpu.dot_dimension_numbers<[2], [1], [1], [2], [0, 0, 0, 1, 1, 2], [0], [0]>} : vector<1x8x8xbf16>, vector<1x8x8xbf16>, vector<1x8x8xf32> -> vector<1x8x8xf32>
    %86 = tpu.reciprocal %83 {approx = true} : vector<1x8x1xf32> -> vector<1x8x1xf32>
    %87 = vector.broadcast %86 : vector<1x8x1xf32> to vector<1x8x8xf32>
    %88 = arith.mulf %85, %87 : vector<1x8x8xf32>
    %89 = arith.truncf %88 : vector<1x8x8xf32> to vector<1x8x8xbf16>
    %c0_31 = arith.constant 0 : index
    %c0_32 = arith.constant 0 : index
    %c16 = arith.constant 16 : index
    %90 = vector.load %arg7[%c0_31, %c0_32, %c16] : memref<1x8x32xbf16, #tpu.memory_space<vmem>>, vector<1x8x8xbf16>
    tpu.vector_store %arg7[%c0_31, %c0_32, %c16], %89 {strides = array<i32>} : memref<1x8x32xbf16, #tpu.memory_space<vmem>>, vector<1x8x8xbf16>,
    %91 = vector.extract_strided_slice %34 {offsets = [0, 0, 24], sizes = [1, 8, 8], strides = [1, 1, 1]} : vector<1x8x32xbf16> to vector<1x8x8xbf16>
    %92 = vector.extract_strided_slice %35 {offsets = [0, 0, 24], sizes = [1, 8, 8], strides = [1, 1, 1]} : vector<1x8x32xbf16> to vector<1x8x8xbf16>
    %93 = vector.extract_strided_slice %36 {offsets = [0, 0, 24], sizes = [1, 8, 8], strides = [1, 1, 1]} : vector<1x8x32xbf16> to vector<1x8x8xbf16>
    %cst_33 = arith.constant dense<0.000000e+00> : vector<1x8x8xf32>
    %94 = tpu.matmul %91, %92, %cst_33 {dimension_numbers = #tpu.dot_dimension_numbers<[2], [2], [1], [1], [0, 0, 0, 1, 1, 1], [0], [0]>} : vector<1x8x8xbf16>, vector<1x8x8xbf16>, vector<1x8x8xf32> -> vector<1x8x8xf32>
    %cst_34 = arith.constant dense<0xFF800000> : vector<1x8xf32>
    %95 = vector.multi_reduction <maximumf>, %94, %cst_34 [2] : vector<1x8x8xf32> to vector<1x8xf32>
    %96 = vector.shape_cast %95 : vector<1x8xf32> to vector<1x8x1xf32>
    %97 = vector.broadcast %96 : vector<1x8x1xf32> to vector<1x8x8xf32>
    %98 = arith.subf %94, %97 : vector<1x8x8xf32>
    %99 = math.exp %98 : vector<1x8x8xf32>
    %cst_35 = arith.constant dense<0.000000e+00> : vector<1x8xf32>
    %100 = vector.multi_reduction <add>, %99, %cst_35 [2] : vector<1x8x8xf32> to vector<1x8xf32>
    %101 = vector.shape_cast %100 : vector<1x8xf32> to vector<1x8x1xf32>
    %102 = arith.truncf %99 : vector<1x8x8xf32> to vector<1x8x8xbf16>
    %cst_36 = arith.constant dense<0.000000e+00> : vector<1x8x8xf32>
    %103 = tpu.matmul %102, %93, %cst_36 {dimension_numbers = #tpu.dot_dimension_numbers<[2], [1], [1], [2], [0, 0, 0, 1, 1, 2], [0], [0]>} : vector<1x8x8xbf16>, vector<1x8x8xbf16>, vector<1x8x8xf32> -> vector<1x8x8xf32>
    %104 = tpu.reciprocal %101 {approx = true} : vector<1x8x1xf32> -> vector<1x8x1xf32>
    %105 = vector.broadcast %104 : vector<1x8x1xf32> to vector<1x8x8xf32>
    %106 = arith.mulf %103, %105 : vector<1x8x8xf32>
    %107 = arith.truncf %106 : vector<1x8x8xf32> to vector<1x8x8xbf16>
    %c0_37 = arith.constant 0 : index
    %c0_38 = arith.constant 0 : index
    %c24 = arith.constant 24 : index
    %108 = vector.load %arg7[%c0_37, %c0_38, %c24] : memref<1x8x32xbf16, #tpu.memory_space<vmem>>, vector<1x8x8xbf16>
    tpu.vector_store %arg7[%c0_37, %c0_38, %c24], %107 {strides = array<i32>} : memref<1x8x32xbf16, #tpu.memory_space<vmem>>, vector<1x8x8xbf16>,
    %c0_39 = arith.constant 0 : index
    %c0_40 = arith.constant 0 : index
    %c0_41 = arith.constant 0 : index
    %109 = vector.load %arg7[%c0_39, %c0_40, %c0_41] : memref<1x8x32xbf16, #tpu.memory_space<vmem>>, vector<1x8x32xbf16>
    %110 = vector.shape_cast %109 : vector<1x8x32xbf16> to vector<8x32xbf16>
    %c2 = arith.constant 2 : index
    %c0_42 = arith.constant 0 : index
    %111 = vector.load %arg2[%c2, %c0_42] : memref<3x32xf32, #tpu.memory_space<vmem>>, vector<1x32xf32>
    %c0_43 = arith.constant 0 : index
    %c0_44 = arith.constant 0 : index
    %112 = vector.load %arg5[%c0_43, %c0_44] : memref<32x32xbf16, #tpu.memory_space<vmem>>, vector<32x32xbf16>
    %cst_45 = arith.constant dense<0.000000e+00> : vector<8x32xf32>
    %113 = tpu.matmul %110, %112, %cst_45 {dimension_numbers = #tpu.dot_dimension_numbers<[1], [0], [0], [1], [0, 0, 1, 1], [], []>} : vector<8x32xbf16>, vector<32x32xbf16>, vector<8x32xf32> -> vector<8x32xf32>
    %114 = vector.broadcast %111 : vector<1x32xf32> to vector<8x32xf32>
    %115 = arith.addf %113, %114 : vector<8x32xf32>
    %116 = vector.shape_cast %115 : vector<8x32xf32> to vector<1x8x32xf32>
    %c0_46 = arith.constant 0 : index
    %c0_47 = arith.constant 0 : index
    %c0_48 = arith.constant 0 : index
    %117 = vector.load %arg1[%c0_46, %c0_47, %c0_48] : memref<1x8x32xf32, #tpu.memory_space<vmem>>, vector<1x8x32xf32>
    %118 = arith.addf %116, %117 : vector<1x8x32xf32>
    %c0_49 = arith.constant 0 : index
    %c0_50 = arith.constant 0 : index
    %c0_51 = arith.constant 0 : index
    %119 = vector.load %arg6[%c0_49, %c0_50, %c0_51] : memref<1x8x32xf32, #tpu.memory_space<vmem>>, vector<1x8x32xf32>
    tpu.vector_store %arg6[%c0_49, %c0_50, %c0_51], %118 {strides = array<i32>} : memref<1x8x32xf32, #tpu.memory_space<vmem>>, vector<1x8x32xf32>,
    return
  }
  func.func @transform_0(%arg0: i32) -> (i32, i32, i32) {
    %c0_i32 = arith.constant 0 : i32
    %c0_i32_0 = arith.constant 0 : i32
    %c0_i32_1 = arith.constant 0 : i32
    return %arg0, %c0_i32, %c0_i32_0 : i32, i32, i32
  }
  func.func @transform_1(%arg0: i32) -> (i32, i32) {
    %c0_i32 = arith.constant 0 : i32
    %c0_i32_0 = arith.constant 0 : i32
    %c0_i32_1 = arith.constant 0 : i32
    return %c0_i32, %c0_i32_0 : i32, i32
  }
  func.func @transform_2(%arg0: i32) -> (i32, i32) {
    %c0_i32 = arith.constant 0 : i32
    %c0_i32_0 = arith.constant 0 : i32
    %c0_i32_1 = arith.constant 0 : i32
    return %c0_i32, %c0_i32_0 : i32, i32
  }
  func.func @transform_3(%arg0: i32) -> (i32, i32) {
    %c0_i32 = arith.constant 0 : i32
    %c0_i32_0 = arith.constant 0 : i32
    %c0_i32_1 = arith.constant 0 : i32
    return %c0_i32, %c0_i32_0 : i32, i32
  }
  func.func @transform_4(%arg0: i32) -> (i32, i32) {
    %c0_i32 = arith.constant 0 : i32
    %c0_i32_0 = arith.constant 0 : i32
    %c0_i32_1 = arith.constant 0 : i32
    return %c0_i32, %c0_i32_0 : i32, i32
  }
  func.func @transform_5(%arg0: i32) -> (i32, i32, i32) {
    %c0_i32 = arith.constant 0 : i32
    %c0_i32_0 = arith.constant 0 : i32
    %c0_i32_1 = arith.constant 0 : i32
    return %arg0, %c0_i32, %c0_i32_0 : i32, i32, i32
  }
}

module attributes {stable_mosaic.version = 11 : i64} {
  func.func @attn_block_kernel(%arg0: i32, %arg1: memref<1x8x32xf32, #tpu.memory_space<vmem>>, %arg2: memref<3x32xf32, #tpu.memory_space<vmem>>, %arg3: memref<1x96xf32, #tpu.memory_space<vmem>>, %arg4: memref<32x96xbf16, #tpu.memory_space<vmem>>, %arg5: memref<32x32xbf16, #tpu.memory_space<vmem>>, %arg6: memref<1x8x32xf32, #tpu.memory_space<vmem>>, %arg7: memref<1x8x32xbf16, #tpu.memory_space<vmem>>) attributes {dimension_semantics = [#tpu.dimension_semantics<parallel>], iteration_bounds = array<i64: 2>, scalar_prefetch = 0 : i64, scratch_operands = 1 : i64, tpu.core_type = #tpu.core_type<tc>, window_params = [{transform_indices = @transform_0, window_bounds = array<i64: 1, 8, 32>}, {pipeline_mode = #tpu.pipeline_mode<synchronous>, transform_indices = @transform_1, window_bounds = array<i64: 3, 32>}, {pipeline_mode = #tpu.pipeline_mode<synchronous>, transform_indices = @transform_2, window_bounds = array<i64: 1, 96>}, {pipeline_mode = #tpu.pipeline_mode<synchronous>, transform_indices = @transform_3, window_bounds = array<i64: 32, 96>}, {pipeline_mode = #tpu.pipeline_mode<synchronous>, transform_indices = @transform_4, window_bounds = array<i64: 32, 32>}, {transform_indices = @transform_5, window_bounds = array<i64: 1, 8, 32>}]} {
    %c0 = arith.constant 0 : index
    %c0_0 = arith.constant 0 : index
    %c0_1 = arith.constant 0 : index
    %0 = vector.load %arg1[%c0, %c0_0, %c0_1] : memref<1x8x32xf32, #tpu.memory_space<vmem>>, vector<1x8x32xf32>
    %1 = vector.shape_cast %0 : vector<1x8x32xf32> to vector<8x32xf32>
    %c0_2 = arith.constant 0 : index
    %c0_3 = arith.constant 0 : index
    %2 = vector.load %arg2[%c0_2, %c0_3] : memref<3x32xf32, #tpu.memory_space<vmem>>, vector<1x32xf32>
    %c1 = arith.constant 1 : index
    %c0_4 = arith.constant 0 : index
    %3 = vector.load %arg2[%c1, %c0_4] : memref<3x32xf32, #tpu.memory_space<vmem>>, vector<1x32xf32>
    %cst = arith.constant dense<0.000000e+00> : vector<8xf32>
    %4 = vector.multi_reduction <add>, %1, %cst [1] : vector<8x32xf32> to vector<8xf32>
    %5 = vector.shape_cast %4 : vector<8xf32> to vector<8x1xf32>
    %cst_5 = arith.constant 3.200000e+01 : f32
    %6 = vector.broadcast %cst_5 : f32 to vector<8x1xf32>
    %7 = arith.divf %5, %6 : vector<8x1xf32>
    %8 = vector.broadcast %7 : vector<8x1xf32> to vector<8x32xf32>
    %9 = arith.subf %1, %8 : vector<8x32xf32>
    %10 = arith.mulf %9, %9 : vector<8x32xf32>
    %cst_6 = arith.constant dense<0.000000e+00> : vector<8xf32>
    %11 = vector.multi_reduction <add>, %10, %cst_6 [1] : vector<8x32xf32> to vector<8xf32>
    %12 = vector.shape_cast %11 : vector<8xf32> to vector<8x1xf32>
    %cst_7 = arith.constant 3.200000e+01 : f32
    %13 = vector.broadcast %cst_7 : f32 to vector<8x1xf32>
    %14 = arith.divf %12, %13 : vector<8x1xf32>
    %15 = vector.broadcast %7 : vector<8x1xf32> to vector<8x32xf32>
    %16 = arith.subf %1, %15 : vector<8x32xf32>
    %cst_8 = arith.constant 9.99999997E-7 : f32
    %17 = vector.broadcast %cst_8 : f32 to vector<8x1xf32>
    %18 = arith.addf %14, %17 : vector<8x1xf32>
    %19 = math.rsqrt %18 : vector<8x1xf32>
    %20 = vector.broadcast %19 : vector<8x1xf32> to vector<8x32xf32>
    %21 = arith.mulf %16, %20 : vector<8x32xf32>
    %22 = vector.broadcast %2 : vector<1x32xf32> to vector<8x32xf32>
    %23 = arith.mulf %21, %22 : vector<8x32xf32>
    %24 = vector.broadcast %3 : vector<1x32xf32> to vector<8x32xf32>
    %25 = arith.addf %23, %24 : vector<8x32xf32>
    %26 = arith.truncf %25 : vector<8x32xf32> to vector<8x32xbf16>
    %c0_9 = arith.constant 0 : index
    %c0_10 = arith.constant 0 : index
    %27 = vector.load %arg4[%c0_9, %c0_10] : memref<32x96xbf16, #tpu.memory_space<vmem>>, vector<32x96xbf16>
    %cst_11 = arith.constant dense<0.000000e+00> : vector<8x96xf32>
    %28 = tpu.matmul %26, %27, %cst_11 {dimension_numbers = #tpu.dot_dimension_numbers<[1], [0], [0], [1], [0, 0, 1, 1], [], []>} : vector<8x32xbf16>, vector<32x96xbf16>, vector<8x96xf32> -> vector<8x96xf32>
    %c0_12 = arith.constant 0 : index
    %c0_13 = arith.constant 0 : index
    %29 = vector.load %arg3[%c0_12, %c0_13] : memref<1x96xf32, #tpu.memory_space<vmem>>, vector<1x96xf32>
    %30 = vector.broadcast %29 : vector<1x96xf32> to vector<8x96xf32>
    %31 = arith.addf %28, %30 : vector<8x96xf32>
    %32 = arith.truncf %31 : vector<8x96xf32> to vector<8x96xbf16>
    %33 = vector.shape_cast %32 : vector<8x96xbf16> to vector<1x8x96xbf16>
    %34 = vector.extract_strided_slice %33 {offsets = [0, 0, 0], sizes = [1, 8, 32], strides = [1, 1, 1]} : vector<1x8x96xbf16> to vector<1x8x32xbf16>
    %35 = vector.extract_strided_slice %33 {offsets = [0, 0, 32], sizes = [1, 8, 32], strides = [1, 1, 1]} : vector<1x8x96xbf16> to vector<1x8x32xbf16>
    %36 = vector.extract_strided_slice %33 {offsets = [0, 0, 64], sizes = [1, 8, 32], strides = [1, 1, 1]} : vector<1x8x96xbf16> to vector<1x8x32xbf16>
    %37 = vector.extract_strided_slice %34 {offsets = [0, 0, 0], sizes = [1, 8, 8], strides = [1, 1, 1]} : vector<1x8x32xbf16> to vector<1x8x8xbf16>
    %38 = vector.extract_strided_slice %35 {offsets = [0, 0, 0], sizes = [1, 8, 8], strides = [1, 1, 1]} : vector<1x8x32xbf16> to vector<1x8x8xbf16>
    %39 = vector.extract_strided_slice %36 {offsets = [0, 0, 0], sizes = [1, 8, 8], strides = [1, 1, 1]} : vector<1x8x32xbf16> to vector<1x8x8xbf16>
    %cst_14 = arith.constant dense<0.000000e+00> : vector<1x8x8xf32>
    %40 = tpu.matmul %37, %38, %cst_14 {dimension_numbers = #tpu.dot_dimension_numbers<[2], [2], [1], [1], [0, 0, 0, 1, 1, 1], [0], [0]>} : vector<1x8x8xbf16>, vector<1x8x8xbf16>, vector<1x8x8xf32> -> vector<1x8x8xf32>
    %cst_15 = arith.constant dense<0xFF800000> : vector<1x8xf32>
    %41 = vector.multi_reduction <maximumf>, %40, %cst_15 [2] : vector<1x8x8xf32> to vector<1x8xf32>
    %42 = vector.shape_cast %41 : vector<1x8xf32> to vector<1x8x1xf32>
    %43 = vector.broadcast %42 : vector<1x8x1xf32> to vector<1x8x8xf32>
    %44 = arith.subf %40, %43 : vector<1x8x8xf32>
    %45 = math.exp %44 : vector<1x8x8xf32>
    %cst_16 = arith.constant dense<0.000000e+00> : vector<1x8xf32>
    %46 = vector.multi_reduction <add>, %45, %cst_16 [2] : vector<1x8x8xf32> to vector<1x8xf32>
    %47 = vector.shape_cast %46 : vector<1x8xf32> to vector<1x8x1xf32>
    %48 = arith.truncf %45 : vector<1x8x8xf32> to vector<1x8x8xbf16>
    %cst_17 = arith.constant dense<0.000000e+00> : vector<1x8x8xf32>
    %49 = tpu.matmul %48, %39, %cst_17 {dimension_numbers = #tpu.dot_dimension_numbers<[2], [1], [1], [2], [0, 0, 0, 1, 1, 2], [0], [0]>} : vector<1x8x8xbf16>, vector<1x8x8xbf16>, vector<1x8x8xf32> -> vector<1x8x8xf32>
    %50 = tpu.reciprocal %47 {approx = true} : vector<1x8x1xf32> -> vector<1x8x1xf32>
    %51 = vector.broadcast %50 : vector<1x8x1xf32> to vector<1x8x8xf32>
    %52 = arith.mulf %49, %51 : vector<1x8x8xf32>
    %53 = arith.truncf %52 : vector<1x8x8xf32> to vector<1x8x8xbf16>
    %c0_18 = arith.constant 0 : index
    %c0_19 = arith.constant 0 : index
    %c0_20 = arith.constant 0 : index
    %54 = vector.load %arg7[%c0_18, %c0_19, %c0_20] : memref<1x8x32xbf16, #tpu.memory_space<vmem>>, vector<1x8x8xbf16>
    tpu.vector_store %arg7[%c0_18, %c0_19, %c0_20], %53 {strides = array<i32>} : memref<1x8x32xbf16, #tpu.memory_space<vmem>>, vector<1x8x8xbf16>,
    %55 = vector.extract_strided_slice %34 {offsets = [0, 0, 8], sizes = [1, 8, 8], strides = [1, 1, 1]} : vector<1x8x32xbf16> to vector<1x8x8xbf16>
    %56 = vector.extract_strided_slice %35 {offsets = [0, 0, 8], sizes = [1, 8, 8], strides = [1, 1, 1]} : vector<1x8x32xbf16> to vector<1x8x8xbf16>
    %57 = vector.extract_strided_slice %36 {offsets = [0, 0, 8], sizes = [1, 8, 8], strides = [1, 1, 1]} : vector<1x8x32xbf16> to vector<1x8x8xbf16>
    %cst_21 = arith.constant dense<0.000000e+00> : vector<1x8x8xf32>
    %58 = tpu.matmul %55, %56, %cst_21 {dimension_numbers = #tpu.dot_dimension_numbers<[2], [2], [1], [1], [0, 0, 0, 1, 1, 1], [0], [0]>} : vector<1x8x8xbf16>, vector<1x8x8xbf16>, vector<1x8x8xf32> -> vector<1x8x8xf32>
    %cst_22 = arith.constant dense<0xFF800000> : vector<1x8xf32>
    %59 = vector.multi_reduction <maximumf>, %58, %cst_22 [2] : vector<1x8x8xf32> to vector<1x8xf32>
    %60 = vector.shape_cast %59 : vector<1x8xf32> to vector<1x8x1xf32>
    %61 = vector.broadcast %60 : vector<1x8x1xf32> to vector<1x8x8xf32>
    %62 = arith.subf %58, %61 : vector<1x8x8xf32>
    %63 = math.exp %62 : vector<1x8x8xf32>
    %cst_23 = arith.constant dense<0.000000e+00> : vector<1x8xf32>
    %64 = vector.multi_reduction <add>, %63, %cst_23 [2] : vector<1x8x8xf32> to vector<1x8xf32>
    %65 = vector.shape_cast %64 : vector<1x8xf32> to vector<1x8x1xf32>
    %66 = arith.truncf %63 : vector<1x8x8xf32> to vector<1x8x8xbf16>
    %cst_24 = arith.constant dense<0.000000e+00> : vector<1x8x8xf32>
    %67 = tpu.matmul %66, %57, %cst_24 {dimension_numbers = #tpu.dot_dimension_numbers<[2], [1], [1], [2], [0, 0, 0, 1, 1, 2], [0], [0]>} : vector<1x8x8xbf16>, vector<1x8x8xbf16>, vector<1x8x8xf32> -> vector<1x8x8xf32>
    %68 = tpu.reciprocal %65 {approx = true} : vector<1x8x1xf32> -> vector<1x8x1xf32>
    %69 = vector.broadcast %68 : vector<1x8x1xf32> to vector<1x8x8xf32>
    %70 = arith.mulf %67, %69 : vector<1x8x8xf32>
    %71 = arith.truncf %70 : vector<1x8x8xf32> to vector<1x8x8xbf16>
    %c0_25 = arith.constant 0 : index
    %c0_26 = arith.constant 0 : index
    %c8 = arith.constant 8 : index
    %72 = vector.load %arg7[%c0_25, %c0_26, %c8] : memref<1x8x32xbf16, #tpu.memory_space<vmem>>, vector<1x8x8xbf16>
    tpu.vector_store %arg7[%c0_25, %c0_26, %c8], %71 {strides = array<i32>} : memref<1x8x32xbf16, #tpu.memory_space<vmem>>, vector<1x8x8xbf16>,
    %73 = vector.extract_strided_slice %34 {offsets = [0, 0, 16], sizes = [1, 8, 8], strides = [1, 1, 1]} : vector<1x8x32xbf16> to vector<1x8x8xbf16>
    %74 = vector.extract_strided_slice %35 {offsets = [0, 0, 16], sizes = [1, 8, 8], strides = [1, 1, 1]} : vector<1x8x32xbf16> to vector<1x8x8xbf16>
    %75 = vector.extract_strided_slice %36 {offsets = [0, 0, 16], sizes = [1, 8, 8], strides = [1, 1, 1]} : vector<1x8x32xbf16> to vector<1x8x8xbf16>
    %cst_27 = arith.constant dense<0.000000e+00> : vector<1x8x8xf32>
    %76 = tpu.matmul %73, %74, %cst_27 {dimension_numbers = #tpu.dot_dimension_numbers<[2], [2], [1], [1], [0, 0, 0, 1, 1, 1], [0], [0]>} : vector<1x8x8xbf16>, vector<1x8x8xbf16>, vector<1x8x8xf32> -> vector<1x8x8xf32>
    %cst_28 = arith.constant dense<0xFF800000> : vector<1x8xf32>
    %77 = vector.multi_reduction <maximumf>, %76, %cst_28 [2] : vector<1x8x8xf32> to vector<1x8xf32>
    %78 = vector.shape_cast %77 : vector<1x8xf32> to vector<1x8x1xf32>
    %79 = vector.broadcast %78 : vector<1x8x1xf32> to vector<1x8x8xf32>
    %80 = arith.subf %76, %79 : vector<1x8x8xf32>
    %81 = math.exp %80 : vector<1x8x8xf32>
    %cst_29 = arith.constant dense<0.000000e+00> : vector<1x8xf32>
    %82 = vector.multi_reduction <add>, %81, %cst_29 [2] : vector<1x8x8xf32> to vector<1x8xf32>
    %83 = vector.shape_cast %82 : vector<1x8xf32> to vector<1x8x1xf32>
    %84 = arith.truncf %81 : vector<1x8x8xf32> to vector<1x8x8xbf16>
    %cst_30 = arith.constant dense<0.000000e+00> : vector<1x8x8xf32>
    %85 = tpu.matmul %84, %75, %cst_30 {dimension_numbers = #tpu.dot_dimension_numbers<[2], [1], [1], [2], [0, 0, 0, 1, 1, 2], [0], [0]>} : vector<1x8x8xbf16>, vector<1x8x8xbf16>, vector<1x8x8xf32> -> vector<1x8x8xf32>
    %86 = tpu.reciprocal %83 {approx = true} : vector<1x8x1xf32> -> vector<1x8x1xf32>
    %87 = vector.broadcast %86 : vector<1x8x1xf32> to vector<1x8x8xf32>
    %88 = arith.mulf %85, %87 : vector<1x8x8xf32>
    %89 = arith.truncf %88 : vector<1x8x8xf32> to vector<1x8x8xbf16>
    %c0_31 = arith.constant 0 : index
    %c0_32 = arith.constant 0 : index
    %c16 = arith.constant 16 : index
    %90 = vector.load %arg7[%c0_31, %c0_32, %c16] : memref<1x8x32xbf16, #tpu.memory_space<vmem>>, vector<1x8x8xbf16>
    tpu.vector_store %arg7[%c0_31, %c0_32, %c16], %89 {strides = array<i32>} : memref<1x8x32xbf16, #tpu.memory_space<vmem>>, vector<1x8x8xbf16>,
    %91 = vector.extract_strided_slice %34 {offsets = [0, 0, 24], sizes = [1, 8, 8], strides = [1, 1, 1]} : vector<1x8x32xbf16> to vector<1x8x8xbf16>
    %92 = vector.extract_strided_slice %35 {offsets = [0, 0, 24], sizes = [1, 8, 8], strides = [1, 1, 1]} : vector<1x8x32xbf16> to vector<1x8x8xbf16>
    %93 = vector.extract_strided_slice %36 {offsets = [0, 0, 24], sizes = [1, 8, 8], strides = [1, 1, 1]} : vector<1x8x32xbf16> to vector<1x8x8xbf16>
    %cst_33 = arith.constant dense<0.000000e+00> : vector<1x8x8xf32>
    %94 = tpu.matmul %91, %92, %cst_33 {dimension_numbers = #tpu.dot_dimension_numbers<[2], [2], [1], [1], [0, 0, 0, 1, 1, 1], [0], [0]>} : vector<1x8x8xbf16>, vector<1x8x8xbf16>, vector<1x8x8xf32> -> vector<1x8x8xf32>
    %cst_34 = arith.constant dense<0xFF800000> : vector<1x8xf32>
    %95 = vector.multi_reduction <maximumf>, %94, %cst_34 [2] : vector<1x8x8xf32> to vector<1x8xf32>
    %96 = vector.shape_cast %95 : vector<1x8xf32> to vector<1x8x1xf32>
    %97 = vector.broadcast %96 : vector<1x8x1xf32> to vector<1x8x8xf32>
    %98 = arith.subf %94, %97 : vector<1x8x8xf32>
    %99 = math.exp %98 : vector<1x8x8xf32>
    %cst_35 = arith.constant dense<0.000000e+00> : vector<1x8xf32>
    %100 = vector.multi_reduction <add>, %99, %cst_35 [2] : vector<1x8x8xf32> to vector<1x8xf32>
    %101 = vector.shape_cast %100 : vector<1x8xf32> to vector<1x8x1xf32>
    %102 = arith.truncf %99 : vector<1x8x8xf32> to vector<1x8x8xbf16>
    %cst_36 = arith.constant dense<0.000000e+00> : vector<1x8x8xf32>
    %103 = tpu.matmul %102, %93, %cst_36 {dimension_numbers = #tpu.dot_dimension_numbers<[2], [1], [1], [2], [0, 0, 0, 1, 1, 2], [0], [0]>} : vector<1x8x8xbf16>, vector<1x8x8xbf16>, vector<1x8x8xf32> -> vector<1x8x8xf32>
    %104 = tpu.reciprocal %101 {approx = true} : vector<1x8x1xf32> -> vector<1x8x1xf32>
    %105 = vector.broadcast %104 : vector<1x8x1xf32> to vector<1x8x8xf32>
    %106 = arith.mulf %103, %105 : vector<1x8x8xf32>
    %107 = arith.truncf %106 : vector<1x8x8xf32> to vector<1x8x8xbf16>
    %c0_37 = arith.constant 0 : index
    %c0_38 = arith.constant 0 : index
    %c24 = arith.constant 24 : index
    %108 = vector.load %arg7[%c0_37, %c0_38, %c24] : memref<1x8x32xbf16, #tpu.memory_space<vmem>>, vector<1x8x8xbf16>
    tpu.vector_store %arg7[%c0_37, %c0_38, %c24], %107 {strides = array<i32>} : memref<1x8x32xbf16, #tpu.memory_space<vmem>>, vector<1x8x8xbf16>,
    %c0_39 = arith.constant 0 : index
    %c0_40 = arith.constant 0 : index
    %c0_41 = arith.constant 0 : index
    %109 = vector.load %arg7[%c0_39, %c0_40, %c0_41] : memref<1x8x32xbf16, #tpu.memory_space<vmem>>, vector<1x8x32xbf16>
    %110 = vector.shape_cast %109 : vector<1x8x32xbf16> to vector<8x32xbf16>
    %c2 = arith.constant 2 : index
    %c0_42 = arith.constant 0 : index
    %111 = vector.load %arg2[%c2, %c0_42] : memref<3x32xf32, #tpu.memory_space<vmem>>, vector<1x32xf32>
    %c0_43 = arith.constant 0 : index
    %c0_44 = arith.constant 0 : index
    %112 = vector.load %arg5[%c0_43, %c0_44] : memref<32x32xbf16, #tpu.memory_space<vmem>>, vector<32x32xbf16>
    %cst_45 = arith.constant dense<0.000000e+00> : vector<8x32xf32>
    %113 = tpu.matmul %110, %112, %cst_45 {dimension_numbers = #tpu.dot_dimension_numbers<[1], [0], [0], [1], [0, 0, 1, 1], [], []>} : vector<8x32xbf16>, vector<32x32xbf16>, vector<8x32xf32> -> vector<8x32xf32>
    %114 = vector.broadcast %111 : vector<1x32xf32> to vector<8x32xf32>
    %115 = arith.addf %113, %114 : vector<8x32xf32>
    %116 = vector.shape_cast %115 : vector<8x32xf32> to vector<1x8x32xf32>
    %c0_46 = arith.constant 0 : index
    %c0_47 = arith.constant 0 : index
    %c0_48 = arith.constant 0 : index
    %117 = vector.load %arg1[%c0_46, %c0_47, %c0_48] : memref<1x8x32xf32, #tpu.memory_space<vmem>>, vector<1x8x32xf32>
    %118 = arith.addf %116, %117 : vector<1x8x32xf32>
    %c0_49 = arith.constant 0 : index
    %c0_50 = arith.constant 0 : index
    %c0_51 = arith.constant 0 : index
    %119 = vector.load %arg6[%c0_49, %c0_50, %c0_51] : memref<1x8x32xf32, #tpu.memory_space<vmem>>, vector<1x8x32xf32>
    tpu.vector_store %arg6[%c0_49, %c0_50, %c0_51], %118 {strides = array<i32>} : memref<1x8x32xf32, #tpu.memory_space<vmem>>, vector<1x8x32xf32>,
    return
  }
  func.func @transform_0(%arg0: i32) -> (i32, i32, i32) {
    %c0_i32 = arith.constant 0 : i32
    %c0_i32_0 = arith.constant 0 : i32
    %c0_i32_1 = arith.constant 0 : i32
    return %arg0, %c0_i32, %c0_i32_0 : i32, i32, i32
  }
  func.func @transform_1(%arg0: i32) -> (i32, i32) {
    %c0_i32 = arith.constant 0 : i32
    %c0_i32_0 = arith.constant 0 : i32
    %c0_i32_1 = arith.constant 0 : i32
    return %c0_i32, %c0_i32_0 : i32, i32
  }
  func.func @transform_2(%arg0: i32) -> (i32, i32) {
    %c0_i32 = arith.constant 0 : i32
    %c0_i32_0 = arith.constant 0 : i32
    %c0_i32_1 = arith.constant 0 : i32
    return %c0_i32, %c0_i32_0 : i32, i32
  }
  func.func @transform_3(%arg0: i32) -> (i32, i32) {
    %c0_i32 = arith.constant 0 : i32
    %c0_i32_0 = arith.constant 0 : i32
    %c0_i32_1 = arith.constant 0 : i32
    return %c0_i32, %c0_i32_0 : i32, i32
  }
  func.func @transform_4(%arg0: i32) -> (i32, i32) {
    %c0_i32 = arith.constant 0 : i32
    %c0_i32_0 = arith.constant 0 : i32
    %c0_i32_1 = arith.constant 0 : i32
    return %c0_i32, %c0_i32_0 : i32, i32
  }
  func.func @transform_5(%arg0: i32) -> (i32, i32, i32) {
    %c0_i32 = arith.constant 0 : i32
    %c0_i32_0 = arith.constant 0 : i32
    %c0_i32_1 = arith.constant 0 : i32
    return %arg0, %c0_i32, %c0_i32_0 : i32, i32, i32
  }
}

</mosaic_0001>

<bundles_post_ra>
// kernel: tpu_custom_call.1
= control target key start
LH: loop header
LB: loop body
LE: loop exit
PB: predicated region body
PF: predicated region fallthrough
CT: control target
= control target key end

     0   :  { %10 = vsyncpa [#allocation4], 0  ;;  %s1853_s0 = inlined_call_operand.hbm [shape: f32[2,8,32], index: 0, kind: input, shape index: {}]   ;;  %s1854_s1 = inlined_call_operand.hbm [shape: f32[3,32], index: 1, kind: input, shape index: {}]   ;;  %s1855_s2 = inlined_call_operand.vmem [shape: f32[1,96], index: 2, kind: input, shape index: {}]   ;;  %s1856_s3 = inlined_call_operand.hbm [shape: bf16[32,96], index: 3, kind: input, shape index: {}]   ;;  %s1857_s4 = inlined_call_operand.hbm [shape: bf16[32,32], index: 4, kind: input, shape index: {}]   ;;  %s1858_s5 = inlined_call_operand.hbm [shape: f32[2,8,32], index: 5, kind: output, shape index: {}]  }
   0x1   :  { %12 = vsyncpa [#allocation4 + $0x1], 0 }
   0x2   :  { %13 = vsyncpa [#allocation7], 0 }
   0x3   :  { %14 = vsyncpa [#allocation10], 0 }
   0x4   :  { %15 = vsyncpa [#allocation5], 0 }
   0x5   :  { %17 = vsyncpa [#allocation5 + $0x1], 0  ;;  %s1519_s18 = smov 0   ;;  %s1521_s19 = smov 0  }
   0x6   :  { %s1523_s20 = smov 0   ;;  %s1525_s21 = smov 0  }
   0x7 LB: > { %s1540_s22 = sadd.s32 4294967295, %s1464_s21   ;;  %s1031_s23 = sadd.s32 4294967294, %s1464_s21   ;;  %s1464_s21 = sphi %s1525_s21, %s1881_s21   ;;  %s1460_s20 = sphi %s1523_s20, %s1880_s20   ;;  %s1456_s19 = sphi %s1521_s19, %s1879_s19   ;;  %s1452_s18 = sphi %s1519_s18, %s1878_s18  }
   0x8   : > { %p43_p0 = scmp.ne.s32.totalorder %s1456_s19, %s1452_s18  ;;  %p1859_p1 = scmp.eq.s32.totalorder %s1540_s22, 0 }
   0x9   : > { %p157_p3 = scmp.eq.s32.totalorder %s1031_s23, 1  ;;  %p1032_p5 = scmp.ge.s32.totalorder %s1464_s21, 1 }
   0xa   : > { %p1549_p4 = por %p1859_p1, %p43_p0  ;;  %p164_p7 = scmp.lt.s32.totalorder %s1464_s21, 3 }
   0xb   : > { %p1554_p6 = por %p157_p3, %p43_p0  ;;  %s1466_s27 = smov [#allocation6]  }
   0xc   : > { %s1862_s24 = scalar_select %p1549_p4, 1, 0 }
   0xd   : > { %s1863_s25 = scalar_select %p1554_p6, 1, 0 }
   0xe   : > { %p1559_p8 = pnand %p1032_p5, %p164_p7  ;;  %s177_s28 = sshll.u32 %s1466_s27, 4  ;;  %s178_s28 = int_to_ptr.vmem [resolvable:$true] %s177_s28 }
   0xf   : > { %s1467_s29 = smov [#allocation8]   ;;  %s1468_s7 = smov [#allocation9]  }
  0x10   : > { %s1864_s26 = scalar_select %p1559_p8, 1, 0 }
  0x11   : > { %p1175_p10 = pneg %p1559_p8  ;;  %s190_s30 = sshll.u32 %s1467_s29, 4  ;;  %s1572_s30 = int_to_ptr.vmem [resolvable:$true] %s190_s30 }
  0x12   : > { %s1574_s8 = sshll.u32 %s1468_s7, 4  ;;  %s1276_s11 = scalar_lea.hbm %s1854_s1, 64  ;;  %s204_s8 = int_to_ptr.vmem [resolvable:$true] %s1574_s8 }
  0x13   : > { %p1568_p11 = pnand %p1175_p10, %p1859_p1  ;;  %p1277_p12 = scmp.ne.s32.totalorder %s1854_s1, %s1276_s11 }
  0x14   : > { %p1283_p5 = scmp.lt.u32.totalorder %s1276_s11, %s1854_s1 }
  0x15   : > { %p1584_p13 = pneg %p1568_p11 }
  0x17   : > { %p1279_p0 = pnand %p1584_p13, %p1277_p12 }
  0x19   : > { %p1280_p3 = pneg %p1279_p0 }
  0x1b   : > { %p1285_p7 = pnand %p1283_p5, %p1280_p3 }
  0x1d   : > { %1288 = shalt.err (!%p1285_p7)
}
  0x1e   : > { %s1289_s17 = scalar_lea.vmem %s178_s28, 64  ;;  %p1297_p2 = scmp.lt.s32.totalorder %s178_s28, %s178_s28 }
  0x1f   : > { %p1290_p10 = scmp.ne.s32.totalorder %s178_s28, %s1289_s17  ;;  %p1298_p6 = scmp.lt.s32.totalorder %s1289_s17, %s1289_s17 }
  0x21   : > { %p1292_p9 = pnand %p1290_p10, %p1584_p13  ;;  %p1299_p4 = por %p1298_p6, %p1297_p2 }
  0x23   : > { %p1293_p1 = pneg %p1292_p9 }
  0x25   : > { %p1300_p8 = pnand %p1299_p4, %p1293_p1 }
  0x27   : > { %1303 = shalt.err (!%p1300_p8)
}
  0x28   : > { %1178 = dma.hbm_to_vmem [thread:$0]  (!%p1568_p11), %s1854_s1, 64, %s178_s28, [#allocation7]  }
  0x29   : > { %s1304_s9 = scalar_lea.hbm %s1856_s3, 256 }
  0x2a   : > { %p1305_p9 = scmp.ne.s32.totalorder %s1856_s3, %s1304_s9  ;;  %p1311_p1 = scmp.lt.u32.totalorder %s1304_s9, %s1856_s3 }
  0x2c   : > { %p1307_p12 = pnand %p1305_p9, %p1584_p13 }
  0x2e   : > { %p1308_p2 = pneg %p1307_p12 }
  0x30   : > { %p1313_p4 = pnand %p1311_p1, %p1308_p2 }
  0x32   : > { %1316 = shalt.err (!%p1313_p4)
}
  0x33   : > { %s1317_s28 = scalar_lea.vmem %s1572_s30, 256  ;;  %p1325_p3 = scmp.lt.s32.totalorder %s1572_s30, %s1572_s30 }
  0x34   : > { %p1318_p6 = scmp.ne.s32.totalorder %s1572_s30, %s1317_s28  ;;  %p1326_p5 = scmp.lt.s32.totalorder %s1317_s28, %s1317_s28 }
  0x36   : > { %p1320_p8 = pnand %p1318_p6, %p1584_p13  ;;  %p1327_p7 = por %p1326_p5, %p1325_p3 }
  0x38   : > { %p1321_p0 = pneg %p1320_p8 }
  0x3a   : > { %p1328_p10 = pnand %p1327_p7, %p1321_p0 }
  0x3c   : > { %1331 = shalt.err (!%p1328_p10)
}
  0x3d   : > { %s1469_s15 = smov 64   ;;  %s1470_s16 = smov 4  }
  0x3e   : > { %1181 = dma.hbm_to_vmem [thread:$0]  (!%p1568_p11), %s1856_s3, 256, %s1572_s30, [#allocation7], %s1469_s15, %s1469_s15, %s1470_s16  }
  0x3f   : > { %s1332_s7 = scalar_lea.hbm %s1857_s4, 256 }
  0x40   : > { %p1333_p9 = scmp.ne.s32.totalorder %s1857_s4, %s1332_s7  ;;  %p1339_p1 = scmp.lt.u32.totalorder %s1332_s7, %s1857_s4 }
  0x42   : > { %p1335_p12 = pnand %p1333_p9, %p1584_p13 }
  0x44   : > { %p1336_p2 = pneg %p1335_p12 }
  0x46   : > { %p1341_p4 = pnand %p1339_p1, %p1336_p2 }
  0x48   : > { %1344 = shalt.err (!%p1341_p4)
}
  0x49   : > { %s1345_s13 = scalar_lea.vmem %s204_s8, 256  ;;  %p1353_p3 = scmp.lt.s32.totalorder %s204_s8, %s204_s8 }
  0x4a   : > { %p1346_p6 = scmp.ne.s32.totalorder %s204_s8, %s1345_s13  ;;  %p1354_p5 = scmp.lt.s32.totalorder %s1345_s13, %s1345_s13 }
  0x4c   : > { %p1348_p8 = pnand %p1346_p6, %p1584_p13  ;;  %p1355_p7 = por %p1354_p5, %p1353_p3 }
  0x4e   : > { %p1349_p0 = pneg %p1348_p8 }
  0x50   : > { %p1356_p10 = pnand %p1355_p7, %p1349_p0 }
  0x52   : > { %1359 = shalt.err (!%p1356_p10)
}
  0x53   : > { %1184 = dma.hbm_to_vmem [thread:$0]  (!%p1568_p11), %s1857_s4, 256, %s204_s8, [#allocation10], %s1469_s15, %s1469_s15, %s1470_s16  }
  0x54   : > { %s1643_s14 = sadd.s32 1, %s1464_s21   ;;  %s30_s6 = sadd.s32 1, %s1460_s20 }
  0x55   : > { %s27_s17 = ssub.s32 %s1464_s21, %s1643_s14  ;;  %p37_p9 = scmp.ne.s32.totalorder %s1460_s20, %s1456_s19 }
  0x56   : > { %p28_p13 = scmp.eq.s32.totalorder %s27_s17, 0  ;;  %p38_p12 = scmp.eq.s32.totalorder %s1464_s21, 0 }
  0x57   : > { %p1196_p2 = scmp.lt.s32.totalorder %s1464_s21, 2  ;;  %p1867_p4 = scmp.eq.s32.totalorder %s1540_s22, 1 }
  0x58   : > { %s1653_s23 = scalar_select %p28_p13, %s1460_s20, %s30_s6  }
  0x59   : > { %p39_p1 = por %p38_p12, %p37_p9  ;;  %p1657_p6 = por %p1867_p4, %p37_p9 }
  0x5a   : > { %s217_s29 = sand.u32 1, %s1460_s20   ;;  %s1038_s7 = sshll.u32 %s1464_s21, 7 }
  0x5b   : > { %s1037_s8 = sshll.u32 %s217_s29, 3  ;;  %s1666_s9 = scalar_lea.hbm %s1853_s0, %s1038_s7 }
  0x5c   : > { %s221_s10 = scalar_lea.vmem [#allocation3], %s1037_s8  ;;  %p1668_p11 = pnand %p1196_p2, %p39_p1 }
  0x5d   : > { %s228_s11 = sshll.u32 %s221_s10, 4  ;;  %s218_s13 = scalar_lea.sflag [#allocation4], %s217_s29  ;;  %s1672_s11 = int_to_ptr.vmem [resolvable:$true] %s228_s11 }
  0x5e   : > { %s1360_s30 = scalar_lea.hbm %s1666_s9, 128  ;;  %p1362_p0 = pneg %p1668_p11 }
  0x5f   : > { %p1361_p8 = scmp.ne.s32.totalorder %s1666_s9, %s1360_s30  ;;  %s1365_s6 = scalar_lea.hbm %s1853_s0, 256 }
  0x60   : > { %p1366_p7 = scmp.lt.u32.totalorder %s1666_s9, %s1853_s0  ;;  %p1367_p10 = scmp.lt.u32.totalorder %s1365_s6, %s1360_s30 }
  0x61   : > { %p1363_p3 = pnand %p1362_p0, %p1361_p8  ;;  %p1369_p9 = scmp.lt.u32.totalorder %s1360_s30, %s1666_s9 }
  0x62   : > { %p1368_p13 = por %p1367_p10, %p1366_p7 }
  0x63   : > { %p1364_p5 = pneg %p1363_p3 }
  0x64   : > { %p1370_p12 = por %p1369_p9, %p1368_p13 }
  0x66   : > { %p1371_p2 = pnand %p1370_p12, %p1364_p5 }
  0x68   : > { %1374 = shalt.err (!%p1371_p2)
}
  0x69   : > { %s1375_s29 = scalar_lea.vmem %s1672_s11, 128  ;;  %s1471_s15 = smov [#allocation3]  }
  0x6a   : > { %p1376_p1 = scmp.ne.s32.totalorder %s1672_s11, %s1375_s29  ;;  %s1380_s16 = sshll.u32 %s1471_s15, 4  ;;  %s1381_s16 = int_to_ptr.vmem [resolvable:$false] %s1380_s16 }
  0x6b   : > { %s1382_s10 = scalar_lea.vmem %s1381_s16, 256  ;;  %p1383_p3 = scmp.lt.s32.totalorder %s1672_s11, %s1381_s16 }
  0x6c   : > { %p1378_p4 = pnand %p1376_p1, %p1362_p0  ;;  %p1384_p7 = scmp.lt.s32.totalorder %s1382_s10, %s1375_s29 }
  0x6e   : > { %p1379_p8 = pneg %p1378_p4  ;;  %p1385_p10 = por %p1384_p7, %p1383_p3 }
  0x70   : > { %p1386_p13 = pnand %p1385_p10, %p1379_p8 }
  0x72   : > { %1389 = shalt.err (!%p1386_p13)
}
  0x73   : > { %1188 = dma.hbm_to_vmem [thread:$0]  (!%p1668_p11), %s1666_s9, 128, %s1672_s11, %s218_s13  }
  0x74   : > { %p1870_p5 = scmp.ne.s32.totalorder %s1864_s26, 0 }
  0x75   : > { %s1702_s30 = sand.u32 (!%p1870_p5), 1, %s1456_s19   ;;  %p1871_p0 = scmp.ne.s32.totalorder (!%p1870_p5), %s1862_s24, 0 }
  0x76   : > { %237 = sbr.rel (%p1870_p5) target bundleno = 1790 (0x6fe), region = 40  ;;  %s1040_s28 = sshll.u32 (!%p1870_p5), %s1702_s30, 3 }
  0x77   : > { %s240_s17 = scalar_lea.sflag (!%p1870_p5), [#allocation4], %s1702_s30  ;;  %s243_s6 = scalar_lea.vmem (!%p1870_p5), [#allocation3], %s1040_s28 }
  0x7d   : > { %1435 = dma.done.wait (%p1871_p0), %s240_s17, 128  }
  0x7e   : > { %1437 = vsyncadd (%p1871_p0), %s240_s17, 4294967168  ;;  %p1872_p11 = scmp.eq.s32.totalorder %s1540_s22, 0 }
  0x80   : > { %1439 = dma.done.wait (%p1872_p11), [#allocation7], 320   ;;  %p1873_p9 = pmov %p1872_p11 }
  0x82   : > { %1441 = vsyncadd (%p1873_p9), [#allocation7], 4294966976  ;;  %p1874_p12 = pmov %p1873_p9 }
  0x83   : > { %p1875_p2 = pmov %p1873_p9 }
  0x84   : > { %1443 = dma.done.wait (%p1874_p12), [#allocation10], 256  }
  0x85   : > { %1445 = vsyncadd (%p1875_p2), [#allocation10], 4294967040  ;;  %vm286_vm0 = vcmask 261120   ;;  %v1720_v0 = vld [vmem:[%s243_s6] sm:$0xff]  ;;  %v1254_v7 = vld [vmem:[#allocation8] sm:$0xff]   ;;  %v1472_v8 = vmov 0.0  }
  0x86   : > { %v287_v1 = vsel %vm286_vm0, %v1720_v0, 0.0  ;;  %1095 = vmatprep.subr.bf16.mxu0 %v1472_v8  ;;  %vm1473_vm1 = vmmov 0   ;;  %v1255_v9 = vld [vmem:[#allocation8 + $0x8] sm:$0xff]   ;;  %1103 = vmatprep.subr.bf16.mxu1 %v1472_v8  ;;  %v1045_v14 = vld [vmem:[#allocation6] ss:$0 sm:$0xff]  ;;  %s1474_s9 = smov 120  }
  0x87   : > { %288 = vadd.xlane.f32.xlu0 %v287_v1  ;;  %1099 = vmatprep.mubr.msk.bf16.mxu0 %vm1473_vm1, %v1472_v8  ;;  %v1046_v16 = vld [vmem:[#allocation6 + $0x1] ss:$0 sm:$0xff]  ;;  %v1047_v20 = vld [vmem:[%s1855_s2] ss:$0 sm:$0xff]  ;;  %s1475_s11 = smov 96   ;;  %s1476_s12 = smov 88  }
  0x88   : > { %1096 = vmatpush3.bf16.msra.mxu0 %v1254_v7  ;;  %1105 = vmatprep.mubr.msk.bf16.mxu1 %vm1473_vm1, %v1472_v8  ;;  %s1477_s13 = smov 80   ;;  %s1478_s7 = smov 112   ;;  %vm382_vm2 = vcmask 64512   ;;  %vm444_vm3 = vcmask 1043456   ;;  %vm491_vm4 = vcmask 60416   ;;  %vm610_vm5 = vcmask 126016  }
  0x89   : > { %1097 = vmatprep.subr.bf16.mxu0 %v1472_v8  ;;  %s1479_s8 = smov 72   ;;  %s1480_s29 = smov 104   ;;  %vm729_vm6 = vcmask 191616   ;;  %vm848_vm7 = vcmask 257216  }
  0x8a   : > { %s1481_s15 = smov 64   ;;  %s1482_s16 = smov 56  }
  0x8b   : > { %s1483_s10 = smov 48   ;;  %s1484_s17 = smov 40  }
  0x8c   : > { %1098 = vmatpush3.bf16.msra.mxu0 %v1255_v9  ;;  %s1485_s6 = smov 8   ;;  %s1486_s24 = smov 16  }
  0x8d   : > { %1109 = vmatprep.subr.bf16.mxu0 %v1472_v8  ;;  %s1487_s26 = smov 24  }
 0x114   : > { %v289_v2 = vpop.xlane.xlu0 %288 }
 0x115   : > { %v291_v3 = vmul.f32 0.03125, %v289_v2 }
 0x117   : > { %v292_v4 = vsub.f32 %v1720_v0, %v291_v3 }
 0x119   : > { %v293_v5 = vmul.f32 %v292_v4, %v292_v4 }
 0x11b   : > { %v294_v6 = vsel %vm286_vm0, %v293_v5, 0.0 }
 0x11c   : > { %295 = vadd.xlane.f32.xlu0 %v294_v6 }
 0x1a9   : > { %v296_v10 = vpop.xlane.xlu0 %295 }
 0x1aa   : > { %v297_v11 = vmul.f32 0.03125, %v296_v10 }
 0x1ac   : > { %v298_v12 = vadd.f32 1e-06, %v297_v11 }
 0x1ae   : > { %1258 = vrsqrt.f32 %v298_v12 }
 0x1b8   : > { %v1259_v13 = vpop.eup %1258 }
 0x1b9   : > { %v300_v15 = vmul.f32 %v1259_v13, %v292_v4 }
 0x1bb   : > { %v305_v17 = vmul.f32 %v1045_v14, %v300_v15 }
 0x1bd   : > { %v310_v18 = vadd.f32 %v1046_v16, %v305_v17 }
 0x1bf   : > { %v311_v19 = vpack.c.bf16 %v310_v18, %v310_v18 }
 0x1c1   : > { %1100 = vmatmul.mubr.msk.bf16.vlgmr.msra.gmra.mrb[0].mxu0 %vm286_vm0, %v311_v19 }
 0x1c2   : > { %1111 = vmatprep.mubr.msk.bf16.mxu0 %vm1473_vm1, %v1472_v8 }
 0x294   : > { %v372_v21 = vpop.f32.mrb[0].mxu0 }
 0x295   : > { %v373_v22 = vadd.f32 %v1047_v20, %v372_v21  ;;  %v1101_v23 = vpop.f32.mrb[1].mxu0 }
 0x296   : > { %v375_v24 = vpop.f32.mrb[2].mxu0 }
 0x297   : > { %v1740_v25 = vpack.c.bf16 %v373_v22, %v373_v22  ;;  %v1102_v26 = vpop.f32.mrb[3].mxu0 }
 0x299   : > { %493 = vrot.lane.b32.xlu0 %v1740_v25, %s1474_s9  ;;  %380 = vrot.lane.b32.xlu1 %v1740_v25, %s1475_s11  ;;  %s1067_s9 = sshll.u32 %s1540_s22, 7  ;;  %s281_s11 = scalar_lea.vmem [#allocation11], %s1040_s28 }
 0x29a   : > { %s919_s22 = scalar_lea.sflag [#allocation5], %s1702_s30 }
 0x29d   : > { %495 = vrot.lane.b32.xlu1 %v1740_v25, %s1476_s12  ;;  %s932_s12 = sshll.u32 %s281_s11, 4  ;;  %s1810_s12 = int_to_ptr.vmem [resolvable:$true] %s932_s12 }
 0x29e   : > { %s1390_s28 = scalar_lea.vmem %s1810_s12, 128 }
 0x29f   : > { %p1391_p1 = scmp.ne.s32.totalorder %s1810_s12, %s1390_s28 }
 0x2a1   : > { %614 = vrot.lane.b32.xlu1 %v1740_v25, %s1477_s13  ;;  %p1392_p4 = pnand %p1391_p1, %p1657_p6 }
 0x2a3   : > { %p1393_p8 = pneg %p1392_p4 }
 0x2a5   : > { %612 = vrot.lane.b32.xlu1 %v1740_v25, %s1478_s7 }
 0x2a9   : > { %733 = vrot.lane.b32.xlu1 %v1740_v25, %s1479_s8  ;;  %s1808_s8 = scalar_lea.hbm %s1858_s5, %s1067_s9 }
 0x2ad   : > { %731 = vrot.lane.b32.xlu1 %v1740_v25, %s1480_s29  ;;  %s1488_s29 = smov [#allocation11]  }
 0x30b   : > { %v381_v27 = vpop.permute.xlu1 %380  ;;  %v494_v32 = vpop.permute.xlu0 %493 }
 0x30c   : > { %v387_v28 = vsel %vm382_vm2, %v381_v27, 0 }
 0x30d   : > { %1104 = vmatpush3.bf16.xpose.msra.mxu1 %v387_v28 }
 0x30e   : > { %1115 = vmatprep.subr.bf16.mxu1 %v1472_v8 }
 0x30f   : > { %v496_v29 = vpop.permute.xlu1 %495 }
 0x310   : > { %v501_v30 = vsel %vm382_vm2, %v496_v29, 0 }
 0x313   : > { %v615_v31 = vpop.permute.xlu1 %614 }
 0x314   : > { %1106 = vmatmul.mubr.msk.bf16.vlgmr.msra.gmra.mrb[0].mxu1 %vm382_vm2, %v1740_v25  ;;  %v620_v34 = vsel %vm382_vm2, %v615_v31, 0 }
 0x315   : > { %1116 = vmatpush3.bf16.xpose.msra.mxu1 %v501_v30  ;;  %1117 = vmatprep.mubr.msk.bf16.mxu1 %vm1473_vm1, %v1472_v8 }
 0x316   : > { %1127 = vmatprep.subr.bf16.mxu1 %v1472_v8 }
 0x317   : > { %v613_v33 = vpop.permute.xlu1 %612 }
 0x31b   : > { %v734_v35 = vpop.permute.xlu1 %733 }
 0x31c   : > { %1118 = vmatmul.mubr.msk.bf16.vlgmr.msra.gmra.mrb[4].mxu1 %vm382_vm2, %v494_v32  ;;  %v739_v36 = vsel %vm382_vm2, %v734_v35, 0 }
 0x31d   : > { %1128 = vmatpush3.bf16.xpose.msra.mxu1 %v620_v34  ;;  %1129 = vmatprep.mubr.msk.bf16.mxu1 %vm1473_vm1, %v1472_v8 }
 0x31e   : > { %1139 = vmatprep.subr.bf16.mxu1 %v1472_v8 }
 0x31f   : > { %v732_v37 = vpop.permute.xlu1 %731 }
 0x324   : > { %1130 = vmatmul.mubr.msk.bf16.vlgmr.msra.gmra.mrb[8].mxu1 %vm382_vm2, %v613_v33 }
 0x325   : > { %1140 = vmatpush3.bf16.xpose.msra.mxu1 %v739_v36  ;;  %1141 = vmatprep.mubr.msk.bf16.mxu1 %vm1473_vm1, %v1472_v8 }
 0x326   : > { %1151 = vmatprep.subr.bf16.mxu1 %v1472_v8 }
 0x32c   : > { %1142 = vmatmul.mubr.msk.bf16.vlgmr.msra.gmra.mrb[12].mxu1 %vm382_vm2, %v732_v37 }
 0x32d   : > { %1155 = vmatprep.mubr.msk.bf16.mxu1 %vm1473_vm1, %v1472_v8 }
 0x3e7   : > { %v423_v38 = vpop.f32.mrb[0].mxu1 }
 0x3e8   : > { %v1107_v39 = vpop.f32.mrb[1].mxu1  ;;  %v429_v40 = vsel %vm382_vm2, %v423_v38, -inf }
 0x3e9   : > { %430 = vmax.xlane.f32.xlu1 %v429_v40  ;;  %v426_v41 = vpop.f32.mrb[2].mxu1 }
 0x3ea   : > { %v1108_v42 = vpop.f32.mrb[3].mxu1 }
 0x3ef   : > { %v537_v43 = vpop.f32.mrb[4].mxu1 }
 0x3f0   : > { %v1119_v44 = vpop.f32.mrb[5].mxu1  ;;  %v543_v45 = vsel %vm382_vm2, %v537_v43, -inf }
 0x3f1   : > { %544 = vmax.xlane.f32.xlu0 %v543_v45  ;;  %v540_v46 = vpop.f32.mrb[6].mxu1 }
 0x3f2   : > { %v1120_v47 = vpop.f32.mrb[7].mxu1 }
 0x3f7   : > { %v656_v48 = vpop.f32.mrb[8].mxu1 }
 0x3f8   : > { %v1131_v49 = vpop.f32.mrb[9].mxu1  ;;  %v662_v57 = vsel %vm382_vm2, %v656_v48, -inf }
 0x3f9   : > { %v659_v50 = vpop.f32.mrb[10].mxu1 }
 0x3fa   : > { %439 = vrot.lane.b32.xlu1 %v1740_v25, %s1481_s15  ;;  %v1132_v51 = vpop.f32.mrb[11].mxu1  ;;  %s1394_s15 = sshll.u32 %s1488_s29, 4  ;;  %s1395_s15 = int_to_ptr.vmem [resolvable:$false] %s1394_s15 }
 0x3fb   : > { %p1397_p3 = scmp.lt.s32.totalorder %s1810_s12, %s1395_s15 }
 0x3ff   : > { %v775_v52 = vpop.f32.mrb[12].mxu1 }
 0x400   : > { %v1143_v53 = vpop.f32.mrb[13].mxu1  ;;  %v781_v54 = vsel %vm382_vm2, %v775_v52, -inf }
 0x401   : > { %782 = vmax.xlane.f32.xlu0 %v781_v54  ;;  %v778_v55 = vpop.f32.mrb[14].mxu1 }
 0x402   : > { %v1144_v56 = vpop.f32.mrb[15].mxu1 }
 0x417   : > { %553 = vrot.lane.b32.xlu0 %v1740_v25, %s1482_s16  ;;  %s1396_s16 = scalar_lea.vmem %s1395_s15, 256 }
 0x418   : > { %p1398_p7 = scmp.lt.s32.totalorder %s1396_s16, %s1390_s28 }
 0x41a   : > { %p1399_p10 = por %p1398_p7, %p1397_p3 }
 0x41c   : > { %p1400_p13 = pnand %p1399_p10, %p1393_p8 }
 0x41e   : > { %663 = vmax.xlane.f32.xlu1 %v662_v57 }
 0x42f   : > { %672 = vrot.lane.b32.xlu1 %v1740_v25, %s1483_s10 }
 0x433   : > { %791 = vrot.lane.b32.xlu1 %v1740_v25, %s1484_s17 }
 0x476   : > { %v431_v58 = vpop.xlane.xlu1 %430 }
 0x477   : > { %v432_v59 = vsub.f32 %v423_v38, %v431_v58 }
 0x479   : > { %v433_v60 = vmul.f32 1.442695, %v432_v59 }
 0x47a   : > { %v440_v61 = vpop.permute.xlu1 %439 }
 0x47b   : > { %1260 = vpow2.f32 %v433_v60  ;;  %v446_v62 = vsel %vm444_vm3, %v440_v61, 0 }
 0x47c   : > { %1110 = vmatpush3.bf16.msra.mxu0 %v446_v62 }
 0x47d   : > { %1121 = vmatprep.subr.bf16.mxu0 %v1472_v8 }
 0x47e   : > { %v545_v63 = vpop.xlane.xlu0 %544 }
 0x47f   : > { %v546_v1 = vsub.f32 %v537_v43, %v545_v63 }
 0x481   : > { %v547_v2 = vmul.f32 1.442695, %v546_v1 }
 0x483   : > { %1262 = vpow2.f32 %v547_v2  ;;  %v1062_v2 = vld [vmem:[#allocation6 + $0x2] ss:$0 sm:$0xff] }
 0x485   : > { %v1261_v3 = vpop.eup %1260 }
 0x486   : > { %v438_v4 = vpack.c.bf16 %v1261_v3, %v1261_v3  ;;  %v435_v16 = vsel %vm382_vm2, %v1261_v3, 0.0 }
 0x488   : > { %1112 = vmatmul.mubr.msk.bf16.vlgmr.msra.gmra.mrb[4].mxu0 %vm382_vm2, %v438_v4 }
 0x489   : > { %1123 = vmatprep.mubr.msk.bf16.mxu0 %vm1473_vm1, %v1472_v8 }
 0x48d   : > { %v1263_v5 = vpop.eup %1262 }
 0x48e   : > { %v783_v6 = vpop.xlane.xlu0 %782  ;;  %v549_v7 = vsel %vm382_vm2, %v1263_v5, 0.0  ;;  %v552_v13 = vpack.c.bf16 %v1263_v5, %v1263_v5 }
 0x48f   : > { %v784_v9 = vsub.f32 %v775_v52, %v783_v6  ;;  %550 = vadd.xlane.f32.xlu0 %v549_v7  ;;  %v1257_v52 = vld [vmem:[#allocation9 + $0x8] sm:$0xff]  }
 0x491   : > { %v785_v10 = vmul.f32 1.442695, %v784_v9 }
 0x492   : > { %v554_v11 = vpop.permute.xlu0 %553 }
 0x493   : > { %1264 = vpow2.f32 %v785_v10  ;;  %v559_v12 = vsel %vm444_vm3, %v554_v11, 0 }
 0x494   : > { %1122 = vmatpush3.bf16.msra.mxu0 %v559_v12 }
 0x495   : > { %1133 = vmatprep.subr.bf16.mxu0 %v1472_v8 }
 0x497   : > { %1124 = vmatmul.mubr.msk.bf16.vlgmr.msra.gmra.mrb[8].mxu0 %vm382_vm2, %v552_v13 }
 0x498   : > { %1135 = vmatprep.mubr.msk.bf16.mxu0 %vm1473_vm1, %v1472_v8 }
 0x49d   : > { %v1265_v14 = vpop.eup %1264 }
 0x49e   : > { %v787_v15 = vsel %vm382_vm2, %v1265_v14, 0.0  ;;  %v790_v27 = vpack.c.bf16 %v1265_v14, %v1265_v14 }
 0x49f   : > { %788 = vadd.xlane.f32.xlu0 %v787_v15 }
 0x4a3   : > { %436 = vadd.xlane.f32.xlu0 %v435_v16 }
 0x4ab   : > { %v664_v17 = vpop.xlane.xlu1 %663 }
 0x4ac   : > { %v665_v18 = vsub.f32 %v656_v48, %v664_v17  ;;  %v1256_v48 = vld [vmem:[#allocation9] sm:$0xff]  }
 0x4ad   : > { %1152 = vmatpush3.bf16.msra.mxu1 %v1256_v48 }
 0x4ae   : > { %v666_v19 = vmul.f32 1.442695, %v665_v18  ;;  %1153 = vmatprep.subr.bf16.mxu1 %v1472_v8 }
 0x4af   : > { %v673_v20 = vpop.permute.xlu1 %672 }
 0x4b0   : > { %1266 = vpow2.f32 %v666_v19  ;;  %v678_v21 = vsel %vm444_vm3, %v673_v20, 0 }
 0x4b1   : > { %1134 = vmatpush3.bf16.msra.mxu0 %v678_v21  ;;  %1154 = vmatpush3.bf16.msra.mxu1 %v1257_v52 }
 0x4b2   : > { %1145 = vmatprep.subr.bf16.mxu0 %v1472_v8 }
 0x4b3   : > { %v792_v23 = vpop.permute.xlu1 %791 }
 0x4b4   : > { %v797_v26 = vsel %vm444_vm3, %v792_v23, 0 }
 0x4ba   : > { %v1267_v22 = vpop.eup %1266 }
 0x4bb   : > { %v668_v24 = vsel %vm382_vm2, %v1267_v22, 0.0  ;;  %v671_v25 = vpack.c.bf16 %v1267_v22, %v1267_v22 }
 0x4bc   : > { %669 = vadd.xlane.f32.xlu1 %v668_v24 }
 0x4bd   : > { %1136 = vmatmul.mubr.msk.bf16.vlgmr.msra.gmra.mrb[12].mxu0 %vm382_vm2, %v671_v25 }
 0x4be   : > { %1146 = vmatpush3.bf16.msra.mxu0 %v797_v26  ;;  %1147 = vmatprep.mubr.msk.bf16.mxu0 %vm1473_vm1, %v1472_v8 }
 0x4c5   : > { %1148 = vmatmul.mubr.msk.bf16.vlgmr.msra.gmra.mrb[16].mxu0 %vm382_vm2, %v790_v27 }
 0x51c   : > { %v551_v28 = vpop.xlane.xlu0 %550 }
 0x52c   : > { %v789_v29 = vpop.xlane.xlu0 %788 }
 0x530   : > { %v437_v30 = vpop.xlane.xlu0 %436 }
 0x531   : > { %1268 = vrcp.f32 %v437_v30 }
 0x532   : > { %1270 = vrcp.f32 %v551_v28 }
 0x53b   : > { %v1269_v31 = vpop.eup %1268 }
 0x53c   : > { %v1271_v38 = vpop.eup %1270 }
 0x549   : > { %v670_v45 = vpop.xlane.xlu1 %669 }
 0x54a   : > { %1272 = vrcp.f32 %v670_v45 }
 0x54b   : > { %1274 = vrcp.f32 %v789_v29 }
 0x554   : > { %v1273_v46 = vpop.eup %1272 }
 0x555   : > { %v1275_v55 = vpop.eup %1274 }
 0x55b   : > { %v482_v32 = vpop.f32.mrb[4].mxu0 }
 0x55c   : > { %v489_v33 = vmul.f32 %v1269_v31, %v482_v32  ;;  %v1113_v34 = vpop.f32.mrb[5].mxu0 }
 0x55d   : > { %v485_v35 = vpop.f32.mrb[6].mxu0 }
 0x55e   : > { %v490_v36 = vpack.c.bf16 %v489_v33, %v489_v33  ;;  %v1114_v37 = vpop.f32.mrb[7].mxu0 }
 0x560   : > { %492 = vst.msk [vmem:[#allocation2] sm:$0xf] %vm491_vm4, %v490_v36 }
 0x56a   : > { %v595_v39 = vpop.f32.mrb[8].mxu0 }
 0x56b   : > { %v602_v40 = vmul.f32 %v1271_v38, %v595_v39  ;;  %v1125_v41 = vpop.f32.mrb[9].mxu0 }
 0x56c   : > { %v598_v42 = vpop.f32.mrb[10].mxu0 }
 0x56d   : > { %v1070_v43 = vpack.c.bf16 %v602_v40, %v602_v40  ;;  %v1126_v44 = vpop.f32.mrb[11].mxu0 }
 0x56f   : > { %607 = vrot.lane.b32.xlu1 %v1070_v43, %s1485_s6 }
 0x590   : > { %v714_v47 = vpop.f32.mrb[12].mxu0 }
 0x591   : > { %v721_v49 = vmul.f32 %v1273_v46, %v714_v47  ;;  %v1137_v50 = vpop.f32.mrb[13].mxu0 }
 0x592   : > { %v717_v51 = vpop.f32.mrb[14].mxu0 }
 0x593   : > { %v1071_v53 = vpack.c.bf16 %v721_v49, %v721_v49  ;;  %v1138_v54 = vpop.f32.mrb[15].mxu0 }
 0x595   : > { %726 = vrot.lane.b32.xlu0 %v1071_v53, %s1486_s24 }
 0x598   : > { %v833_v56 = vpop.f32.mrb[16].mxu0 }
 0x599   : > { %v840_v57 = vmul.f32 %v1275_v55, %v833_v56  ;;  %v1149_v58 = vpop.f32.mrb[17].mxu0 }
 0x59a   : > { %v836_v59 = vpop.f32.mrb[18].mxu0 }
 0x59b   : > { %v1072_v60 = vpack.c.bf16 %v840_v57, %v840_v57  ;;  %v1150_v61 = vpop.f32.mrb[19].mxu0 }
 0x59d   : > { %845 = vrot.lane.b32.xlu1 %v1072_v60, %s1487_s26 }
 0x5e1   : > { %v608_v62 = vpop.permute.xlu1 %607 }
 0x5e2   : > { %611 = vst.msk [vmem:[#allocation2] sm:$0xf] %vm610_vm5, %v608_v62 }
 0x607   : > { %v727_v63 = vpop.permute.xlu0 %726 }
 0x608   : > { %730 = vst.msk [vmem:[#allocation2] sm:$0xf] %vm729_vm6, %v727_v63 }
 0x60f   : > { %v846_v8 = vpop.permute.xlu1 %845 }
 0x610   : > { %849 = vst.msk [vmem:[#allocation2] sm:$0xf] %vm848_vm7, %v846_v8 }
 0x617   : > { %v850_v1 = vld [vmem:[#allocation2] sm:$0xf] }
 0x618   : > { %1156 = vmatmul.mubr.msk.bf16.vlgmr.msra.gmra.mrb[16].mxu1 %vm286_vm0, %v850_v1 }
 0x6eb   : > { %v909_v3 = vpop.f32.mrb[16].mxu1 }
 0x6ec   : > { %v910_v4 = vadd.f32 %v1062_v2, %v909_v3  ;;  %v1157_v5 = vpop.f32.mrb[17].mxu1 }
 0x6ed   : > { %v912_v6 = vpop.f32.mrb[18].mxu1 }
 0x6ee   : > { %v916_v7 = vadd.f32 %v910_v4, %v1720_v0  ;;  %v1158_v9 = vpop.f32.mrb[19].mxu1 }
 0x6f0   : > { %917 = vst.msk [vmem:[%s281_s11] sm:$0xff] %vm286_vm0, %v916_v7 }
 0x6f1   : > { %1403 = shalt.err (!%p1400_p13)
}
 0x6f2   : > { %s1404_s30 = scalar_lea.hbm %s1808_s8, 128  ;;  %s1408_s6 = scalar_lea.hbm %s1858_s5, 256 }
 0x6f3   : > { %p1405_p5 = scmp.ne.s32.totalorder %s1808_s8, %s1404_s30  ;;  %p1409_p9 = scmp.lt.u32.totalorder %s1808_s8, %s1858_s5 }
 0x6f4   : > { %p1410_p12 = scmp.lt.u32.totalorder %s1408_s6, %s1404_s30  ;;  %p1412_p1 = scmp.lt.u32.totalorder %s1404_s30, %s1808_s8 }
 0x6f5   : > { %p1406_p0 = pnand %p1405_p5, %p1657_p6 }
 0x6f6   : > { %p1411_p2 = por %p1410_p12, %p1409_p9 }
 0x6f7   : > { %p1407_p11 = pneg %p1406_p0 }
 0x6f8   : > { %p1413_p4 = por %p1412_p1, %p1411_p2 }
 0x6fa   : > { %p1414_p8 = pnand %p1413_p4, %p1407_p11 }
 0x6fc   : > { %1417 = shalt.err (!%p1414_p8)
}
 0x6fd   : > { %1173 = dma.vmem_to_hbm [thread:$0]  (%p1657_p6), %s1810_s12, 128, %s1808_s8, %s919_s22  }
 0x6fe PF: > { %s944_s9 = sand.u32 1, %s1452_s18   ;;  %p1876_p3 = scmp.ne.s32.totalorder %s1863_s25, 0 }
 0x6ff   : > { %p1877_p7 = scmp.ge.s32.totalorder %s1464_s21, 2  ;;  %s945_s11 = scalar_lea.sflag [#allocation5], %s944_s9 }
 0x701   : > { %p1190_p10 = pnand %p1877_p7, %p1876_p3 }
 0x703   : > { %1447 = dma.done.wait (!%p1190_p10), %s945_s11, 128  }
 0x704   : > { %1449 = vsyncadd (!%p1190_p10), %s945_s11, 4294967168  ;;  %p20_p13 = scmp.ge.s32.totalorder %s1643_s14, 4   ;;  %s1878_s18 = smov %s1456_s19 }
 0x705   : > { %s1879_s19 = smov %s1460_s20  ;;  %s1880_s20 = smov %s1653_s23 }
 0x706   : > { %s1881_s21 = smov %s1643_s14  ;;  %22 = sbr.rel (!%p20_p13) target bundleno = 7 (0x7), region = 97 }
 0x70d   :  { %950 = vsyncpa [#allocation4], 1 }
 0x70e   :  { %952 = vsyncpa [#allocation4 + $0x1], 1 }
 0x70f   :  { %953 = vsyncpa [#allocation7], 1 }
 0x710   :  { %954 = vsyncpa [#allocation10], 1 }
 0x711   :  { %955 = vsyncpa [#allocation5], 1 }
 0x712   :  { %957 = vsyncpa [#allocation5 + $0x1], 1 }

// kernel: tpu_custom_call.1
= control target key start
LH: loop header
LB: loop body
LE: loop exit
PB: predicated region body
PF: predicated region fallthrough
CT: control target
= control target key end

     0   :  { %10 = vsyncpa [#allocation4], 0  ;;  %s1853_s0 = inlined_call_operand.hbm [shape: f32[2,8,32], index: 0, kind: input, shape index: {}]   ;;  %s1854_s1 = inlined_call_operand.hbm [shape: f32[3,32], index: 1, kind: input, shape index: {}]   ;;  %s1855_s2 = inlined_call_operand.vmem [shape: f32[1,96], index: 2, kind: input, shape index: {}]   ;;  %s1856_s3 = inlined_call_operand.hbm [shape: bf16[32,96], index: 3, kind: input, shape index: {}]   ;;  %s1857_s4 = inlined_call_operand.hbm [shape: bf16[32,32], index: 4, kind: input, shape index: {}]   ;;  %s1858_s5 = inlined_call_operand.hbm [shape: f32[2,8,32], index: 5, kind: output, shape index: {}]  }
   0x1   :  { %12 = vsyncpa [#allocation4 + $0x1], 0 }
   0x2   :  { %13 = vsyncpa [#allocation7], 0 }
   0x3   :  { %14 = vsyncpa [#allocation10], 0 }
   0x4   :  { %15 = vsyncpa [#allocation5], 0 }
   0x5   :  { %17 = vsyncpa [#allocation5 + $0x1], 0  ;;  %s1519_s18 = smov 0   ;;  %s1521_s19 = smov 0  }
   0x6   :  { %s1523_s20 = smov 0   ;;  %s1525_s21 = smov 0  }
   0x7 LB: > { %s1540_s22 = sadd.s32 4294967295, %s1464_s21   ;;  %s1031_s23 = sadd.s32 4294967294, %s1464_s21   ;;  %s1464_s21 = sphi %s1525_s21, %s1881_s21   ;;  %s1460_s20 = sphi %s1523_s20, %s1880_s20   ;;  %s1456_s19 = sphi %s1521_s19, %s1879_s19   ;;  %s1452_s18 = sphi %s1519_s18, %s1878_s18  }
   0x8   : > { %p43_p0 = scmp.ne.s32.totalorder %s1456_s19, %s1452_s18  ;;  %p1859_p1 = scmp.eq.s32.totalorder %s1540_s22, 0 }
   0x9   : > { %p157_p3 = scmp.eq.s32.totalorder %s1031_s23, 1  ;;  %p1032_p5 = scmp.ge.s32.totalorder %s1464_s21, 1 }
   0xa   : > { %p1549_p4 = por %p1859_p1, %p43_p0  ;;  %p164_p7 = scmp.lt.s32.totalorder %s1464_s21, 3 }
   0xb   : > { %p1554_p6 = por %p157_p3, %p43_p0  ;;  %s1466_s27 = smov [#allocation6]  }
   0xc   : > { %s1862_s24 = scalar_select %p1549_p4, 1, 0 }
   0xd   : > { %s1863_s25 = scalar_select %p1554_p6, 1, 0 }
   0xe   : > { %p1559_p8 = pnand %p1032_p5, %p164_p7  ;;  %s177_s28 = sshll.u32 %s1466_s27, 4  ;;  %s178_s28 = int_to_ptr.vmem [resolvable:$true] %s177_s28 }
   0xf   : > { %s1467_s29 = smov [#allocation8]   ;;  %s1468_s7 = smov [#allocation9]  }
  0x10   : > { %s1864_s26 = scalar_select %p1559_p8, 1, 0 }
  0x11   : > { %p1175_p10 = pneg %p1559_p8  ;;  %s190_s30 = sshll.u32 %s1467_s29, 4  ;;  %s1572_s30 = int_to_ptr.vmem [resolvable:$true] %s190_s30 }
  0x12   : > { %s1574_s8 = sshll.u32 %s1468_s7, 4  ;;  %s1276_s11 = scalar_lea.hbm %s1854_s1, 64  ;;  %s204_s8 = int_to_ptr.vmem [resolvable:$true] %s1574_s8 }
  0x13   : > { %p1568_p11 = pnand %p1175_p10, %p1859_p1  ;;  %p1277_p12 = scmp.ne.s32.totalorder %s1854_s1, %s1276_s11 }
  0x14   : > { %p1283_p5 = scmp.lt.u32.totalorder %s1276_s11, %s1854_s1 }
  0x15   : > { %p1584_p13 = pneg %p1568_p11 }
  0x17   : > { %p1279_p0 = pnand %p1584_p13, %p1277_p12 }
  0x19   : > { %p1280_p3 = pneg %p1279_p0 }
  0x1b   : > { %p1285_p7 = pnand %p1283_p5, %p1280_p3 }
  0x1d   : > { %1288 = shalt.err (!%p1285_p7)
}
  0x1e   : > { %s1289_s17 = scalar_lea.vmem %s178_s28, 64  ;;  %p1297_p2 = scmp.lt.s32.totalorder %s178_s28, %s178_s28 }
  0x1f   : > { %p1290_p10 = scmp.ne.s32.totalorder %s178_s28, %s1289_s17  ;;  %p1298_p6 = scmp.lt.s32.totalorder %s1289_s17, %s1289_s17 }
  0x21   : > { %p1292_p9 = pnand %p1290_p10, %p1584_p13  ;;  %p1299_p4 = por %p1298_p6, %p1297_p2 }
  0x23   : > { %p1293_p1 = pneg %p1292_p9 }
  0x25   : > { %p1300_p8 = pnand %p1299_p4, %p1293_p1 }
  0x27   : > { %1303 = shalt.err (!%p1300_p8)
}
  0x28   : > { %1178 = dma.hbm_to_vmem [thread:$0]  (!%p1568_p11), %s1854_s1, 64, %s178_s28, [#allocation7]  }
  0x29   : > { %s1304_s9 = scalar_lea.hbm %s1856_s3, 256 }
  0x2a   : > { %p1305_p9 = scmp.ne.s32.totalorder %s1856_s3, %s1304_s9  ;;  %p1311_p1 = scmp.lt.u32.totalorder %s1304_s9, %s1856_s3 }
  0x2c   : > { %p1307_p12 = pnand %p1305_p9, %p1584_p13 }
  0x2e   : > { %p1308_p2 = pneg %p1307_p12 }
  0x30   : > { %p1313_p4 = pnand %p1311_p1, %p1308_p2 }
  0x32   : > { %1316 = shalt.err (!%p1313_p4)
}
  0x33   : > { %s1317_s28 = scalar_lea.vmem %s1572_s30, 256  ;;  %p1325_p3 = scmp.lt.s32.totalorder %s1572_s30, %s1572_s30 }
  0x34   : > { %p1318_p6 = scmp.ne.s32.totalorder %s1572_s30, %s1317_s28  ;;  %p1326_p5 = scmp.lt.s32.totalorder %s1317_s28, %s1317_s28 }
  0x36   : > { %p1320_p8 = pnand %p1318_p6, %p1584_p13  ;;  %p1327_p7 = por %p1326_p5, %p1325_p3 }
  0x38   : > { %p1321_p0 = pneg %p1320_p8 }
  0x3a   : > { %p1328_p10 = pnand %p1327_p7, %p1321_p0 }
  0x3c   : > { %1331 = shalt.err (!%p1328_p10)
}
  0x3d   : > { %s1469_s15 = smov 64   ;;  %s1470_s16 = smov 4  }
  0x3e   : > { %1181 = dma.hbm_to_vmem [thread:$0]  (!%p1568_p11), %s1856_s3, 256, %s1572_s30, [#allocation7], %s1469_s15, %s1469_s15, %s1470_s16  }
  0x3f   : > { %s1332_s7 = scalar_lea.hbm %s1857_s4, 256 }
  0x40   : > { %p1333_p9 = scmp.ne.s32.totalorder %s1857_s4, %s1332_s7  ;;  %p1339_p1 = scmp.lt.u32.totalorder %s1332_s7, %s1857_s4 }
  0x42   : > { %p1335_p12 = pnand %p1333_p9, %p1584_p13 }
  0x44   : > { %p1336_p2 = pneg %p1335_p12 }
  0x46   : > { %p1341_p4 = pnand %p1339_p1, %p1336_p2 }
  0x48   : > { %1344 = shalt.err (!%p1341_p4)
}
  0x49   : > { %s1345_s13 = scalar_lea.vmem %s204_s8, 256  ;;  %p1353_p3 = scmp.lt.s32.totalorder %s204_s8, %s204_s8 }
  0x4a   : > { %p1346_p6 = scmp.ne.s32.totalorder %s204_s8, %s1345_s13  ;;  %p1354_p5 = scmp.lt.s32.totalorder %s1345_s13, %s1345_s13 }
  0x4c   : > { %p1348_p8 = pnand %p1346_p6, %p1584_p13  ;;  %p1355_p7 = por %p1354_p5, %p1353_p3 }
  0x4e   : > { %p1349_p0 = pneg %p1348_p8 }
  0x50   : > { %p1356_p10 = pnand %p1355_p7, %p1349_p0 }
  0x52   : > { %1359 = shalt.err (!%p1356_p10)
}
  0x53   : > { %1184 = dma.hbm_to_vmem [thread:$0]  (!%p1568_p11), %s1857_s4, 256, %s204_s8, [#allocation10], %s1469_s15, %s1469_s15, %s1470_s16  }
  0x54   : > { %s1643_s14 = sadd.s32 1, %s1464_s21   ;;  %s30_s6 = sadd.s32 1, %s1460_s20 }
  0x55   : > { %s27_s17 = ssub.s32 %s1464_s21, %s1643_s14  ;;  %p37_p9 = scmp.ne.s32.totalorder %s1460_s20, %s1456_s19 }
  0x56   : > { %p28_p13 = scmp.eq.s32.totalorder %s27_s17, 0  ;;  %p38_p12 = scmp.eq.s32.totalorder %s1464_s21, 0 }
  0x57   : > { %p1196_p2 = scmp.lt.s32.totalorder %s1464_s21, 2  ;;  %p1867_p4 = scmp.eq.s32.totalorder %s1540_s22, 1 }
  0x58   : > { %s1653_s23 = scalar_select %p28_p13, %s1460_s20, %s30_s6  }
  0x59   : > { %p39_p1 = por %p38_p12, %p37_p9  ;;  %p1657_p6 = por %p1867_p4, %p37_p9 }
  0x5a   : > { %s217_s29 = sand.u32 1, %s1460_s20   ;;  %s1038_s7 = sshll.u32 %s1464_s21, 7 }
  0x5b   : > { %s1037_s8 = sshll.u32 %s217_s29, 3  ;;  %s1666_s9 = scalar_lea.hbm %s1853_s0, %s1038_s7 }
  0x5c   : > { %s221_s10 = scalar_lea.vmem [#allocation3], %s1037_s8  ;;  %p1668_p11 = pnand %p1196_p2, %p39_p1 }
  0x5d   : > { %s228_s11 = sshll.u32 %s221_s10, 4  ;;  %s218_s13 = scalar_lea.sflag [#allocation4], %s217_s29  ;;  %s1672_s11 = int_to_ptr.vmem [resolvable:$true] %s228_s11 }
  0x5e   : > { %s1360_s30 = scalar_lea.hbm %s1666_s9, 128  ;;  %p1362_p0 = pneg %p1668_p11 }
  0x5f   : > { %p1361_p8 = scmp.ne.s32.totalorder %s1666_s9, %s1360_s30  ;;  %s1365_s6 = scalar_lea.hbm %s1853_s0, 256 }
  0x60   : > { %p1366_p7 = scmp.lt.u32.totalorder %s1666_s9, %s1853_s0  ;;  %p1367_p10 = scmp.lt.u32.totalorder %s1365_s6, %s1360_s30 }
  0x61   : > { %p1363_p3 = pnand %p1362_p0, %p1361_p8  ;;  %p1369_p9 = scmp.lt.u32.totalorder %s1360_s30, %s1666_s9 }
  0x62   : > { %p1368_p13 = por %p1367_p10, %p1366_p7 }
  0x63   : > { %p1364_p5 = pneg %p1363_p3 }
  0x64   : > { %p1370_p12 = por %p1369_p9, %p1368_p13 }
  0x66   : > { %p1371_p2 = pnand %p1370_p12, %p1364_p5 }
  0x68   : > { %1374 = shalt.err (!%p1371_p2)
}
  0x69   : > { %s1375_s29 = scalar_lea.vmem %s1672_s11, 128  ;;  %s1471_s15 = smov [#allocation3]  }
  0x6a   : > { %p1376_p1 = scmp.ne.s32.totalorder %s1672_s11, %s1375_s29  ;;  %s1380_s16 = sshll.u32 %s1471_s15, 4  ;;  %s1381_s16 = int_to_ptr.vmem [resolvable:$false] %s1380_s16 }
  0x6b   : > { %s1382_s10 = scalar_lea.vmem %s1381_s16, 256  ;;  %p1383_p3 = scmp.lt.s32.totalorder %s1672_s11, %s1381_s16 }
  0x6c   : > { %p1378_p4 = pnand %p1376_p1, %p1362_p0  ;;  %p1384_p7 = scmp.lt.s32.totalorder %s1382_s10, %s1375_s29 }
  0x6e   : > { %p1379_p8 = pneg %p1378_p4  ;;  %p1385_p10 = por %p1384_p7, %p1383_p3 }
  0x70   : > { %p1386_p13 = pnand %p1385_p10, %p1379_p8 }
  0x72   : > { %1389 = shalt.err (!%p1386_p13)
}
  0x73   : > { %1188 = dma.hbm_to_vmem [thread:$0]  (!%p1668_p11), %s1666_s9, 128, %s1672_s11, %s218_s13  }
  0x74   : > { %p1870_p5 = scmp.ne.s32.totalorder %s1864_s26, 0 }
  0x75   : > { %s1702_s30 = sand.u32 (!%p1870_p5), 1, %s1456_s19   ;;  %p1871_p0 = scmp.ne.s32.totalorder (!%p1870_p5), %s1862_s24, 0 }
  0x76   : > { %237 = sbr.rel (%p1870_p5) target bundleno = 1790 (0x6fe), region = 40  ;;  %s1040_s28 = sshll.u32 (!%p1870_p5), %s1702_s30, 3 }
  0x77   : > { %s240_s17 = scalar_lea.sflag (!%p1870_p5), [#allocation4], %s1702_s30  ;;  %s243_s6 = scalar_lea.vmem (!%p1870_p5), [#allocation3], %s1040_s28 }
  0x7d   : > { %1435 = dma.done.wait (%p1871_p0), %s240_s17, 128  }
  0x7e   : > { %1437 = vsyncadd (%p1871_p0), %s240_s17, 4294967168  ;;  %p1872_p11 = scmp.eq.s32.totalorder %s1540_s22, 0 }
  0x80   : > { %1439 = dma.done.wait (%p1872_p11), [#allocation7], 320   ;;  %p1873_p9 = pmov %p1872_p11 }
  0x82   : > { %1441 = vsyncadd (%p1873_p9), [#allocation7], 4294966976  ;;  %p1874_p12 = pmov %p1873_p9 }
  0x83   : > { %p1875_p2 = pmov %p1873_p9 }
  0x84   : > { %1443 = dma.done.wait (%p1874_p12), [#allocation10], 256  }
  0x85   : > { %1445 = vsyncadd (%p1875_p2), [#allocation10], 4294967040  ;;  %vm286_vm0 = vcmask 261120   ;;  %v1720_v0 = vld [vmem:[%s243_s6] sm:$0xff]  ;;  %v1254_v7 = vld [vmem:[#allocation8] sm:$0xff]   ;;  %v1472_v8 = vmov 0.0  }
  0x86   : > { %v287_v1 = vsel %vm286_vm0, %v1720_v0, 0.0  ;;  %1095 = vmatprep.subr.bf16.mxu0 %v1472_v8  ;;  %vm1473_vm1 = vmmov 0   ;;  %v1255_v9 = vld [vmem:[#allocation8 + $0x8] sm:$0xff]   ;;  %1103 = vmatprep.subr.bf16.mxu1 %v1472_v8  ;;  %v1045_v14 = vld [vmem:[#allocation6] ss:$0 sm:$0xff]  ;;  %s1474_s9 = smov 120  }
  0x87   : > { %288 = vadd.xlane.f32.xlu0 %v287_v1  ;;  %1099 = vmatprep.mubr.msk.bf16.mxu0 %vm1473_vm1, %v1472_v8  ;;  %v1046_v16 = vld [vmem:[#allocation6 + $0x1] ss:$0 sm:$0xff]  ;;  %v1047_v20 = vld [vmem:[%s1855_s2] ss:$0 sm:$0xff]  ;;  %s1475_s11 = smov 96   ;;  %s1476_s12 = smov 88  }
  0x88   : > { %1096 = vmatpush3.bf16.msra.mxu0 %v1254_v7  ;;  %1105 = vmatprep.mubr.msk.bf16.mxu1 %vm1473_vm1, %v1472_v8  ;;  %s1477_s13 = smov 80   ;;  %s1478_s7 = smov 112   ;;  %vm382_vm2 = vcmask 64512   ;;  %vm444_vm3 = vcmask 1043456   ;;  %vm491_vm4 = vcmask 60416   ;;  %vm610_vm5 = vcmask 126016  }
  0x89   : > { %1097 = vmatprep.subr.bf16.mxu0 %v1472_v8  ;;  %s1479_s8 = smov 72   ;;  %s1480_s29 = smov 104   ;;  %vm729_vm6 = vcmask 191616   ;;  %vm848_vm7 = vcmask 257216  }
  0x8a   : > { %s1481_s15 = smov 64   ;;  %s1482_s16 = smov 56  }
  0x8b   : > { %s1483_s10 = smov 48   ;;  %s1484_s17 = smov 40  }
  0x8c   : > { %1098 = vmatpush3.bf16.msra.mxu0 %v1255_v9  ;;  %s1485_s6 = smov 8   ;;  %s1486_s24 = smov 16  }
  0x8d   : > { %1109 = vmatprep.subr.bf16.mxu0 %v1472_v8  ;;  %s1487_s26 = smov 24  }
 0x114   : > { %v289_v2 = vpop.xlane.xlu0 %288 }
 0x115   : > { %v291_v3 = vmul.f32 0.03125, %v289_v2 }
 0x117   : > { %v292_v4 = vsub.f32 %v1720_v0, %v291_v3 }
 0x119   : > { %v293_v5 = vmul.f32 %v292_v4, %v292_v4 }
 0x11b   : > { %v294_v6 = vsel %vm286_vm0, %v293_v5, 0.0 }
 0x11c   : > { %295 = vadd.xlane.f32.xlu0 %v294_v6 }
 0x1a9   : > { %v296_v10 = vpop.xlane.xlu0 %295 }
 0x1aa   : > { %v297_v11 = vmul.f32 0.03125, %v296_v10 }
 0x1ac   : > { %v298_v12 = vadd.f32 1e-06, %v297_v11 }
 0x1ae   : > { %1258 = vrsqrt.f32 %v298_v12 }
 0x1b8   : > { %v1259_v13 = vpop.eup %1258 }
 0x1b9   : > { %v300_v15 = vmul.f32 %v1259_v13, %v292_v4 }
 0x1bb   : > { %v305_v17 = vmul.f32 %v1045_v14, %v300_v15 }
 0x1bd   : > { %v310_v18 = vadd.f32 %v1046_v16, %v305_v17 }
 0x1bf   : > { %v311_v19 = vpack.c.bf16 %v310_v18, %v310_v18 }
 0x1c1   : > { %1100 = vmatmul.mubr.msk.bf16.vlgmr.msra.gmra.mrb[0].mxu0 %vm286_vm0, %v311_v19 }
 0x1c2   : > { %1111 = vmatprep.mubr.msk.bf16.mxu0 %vm1473_vm1, %v1472_v8 }
 0x294   : > { %v372_v21 = vpop.f32.mrb[0].mxu0 }
 0x295   : > { %v373_v22 = vadd.f32 %v1047_v20, %v372_v21  ;;  %v1101_v23 = vpop.f32.mrb[1].mxu0 }
 0x296   : > { %v375_v24 = vpop.f32.mrb[2].mxu0 }
 0x297   : > { %v1740_v25 = vpack.c.bf16 %v373_v22, %v373_v22  ;;  %v1102_v26 = vpop.f32.mrb[3].mxu0 }
 0x299   : > { %493 = vrot.lane.b32.xlu0 %v1740_v25, %s1474_s9  ;;  %380 = vrot.lane.b32.xlu1 %v1740_v25, %s1475_s11  ;;  %s1067_s9 = sshll.u32 %s1540_s22, 7  ;;  %s281_s11 = scalar_lea.vmem [#allocation11], %s1040_s28 }
 0x29a   : > { %s919_s22 = scalar_lea.sflag [#allocation5], %s1702_s30 }
 0x29d   : > { %495 = vrot.lane.b32.xlu1 %v1740_v25, %s1476_s12  ;;  %s932_s12 = sshll.u32 %s281_s11, 4  ;;  %s1810_s12 = int_to_ptr.vmem [resolvable:$true] %s932_s12 }
 0x29e   : > { %s1390_s28 = scalar_lea.vmem %s1810_s12, 128 }
 0x29f   : > { %p1391_p1 = scmp.ne.s32.totalorder %s1810_s12, %s1390_s28 }
 0x2a1   : > { %614 = vrot.lane.b32.xlu1 %v1740_v25, %s1477_s13  ;;  %p1392_p4 = pnand %p1391_p1, %p1657_p6 }
 0x2a3   : > { %p1393_p8 = pneg %p1392_p4 }
 0x2a5   : > { %612 = vrot.lane.b32.xlu1 %v1740_v25, %s1478_s7 }
 0x2a9   : > { %733 = vrot.lane.b32.xlu1 %v1740_v25, %s1479_s8  ;;  %s1808_s8 = scalar_lea.hbm %s1858_s5, %s1067_s9 }
 0x2ad   : > { %731 = vrot.lane.b32.xlu1 %v1740_v25, %s1480_s29  ;;  %s1488_s29 = smov [#allocation11]  }
 0x30b   : > { %v381_v27 = vpop.permute.xlu1 %380  ;;  %v494_v32 = vpop.permute.xlu0 %493 }
 0x30c   : > { %v387_v28 = vsel %vm382_vm2, %v381_v27, 0 }
 0x30d   : > { %1104 = vmatpush3.bf16.xpose.msra.mxu1 %v387_v28 }
 0x30e   : > { %1115 = vmatprep.subr.bf16.mxu1 %v1472_v8 }
 0x30f   : > { %v496_v29 = vpop.permute.xlu1 %495 }
 0x310   : > { %v501_v30 = vsel %vm382_vm2, %v496_v29, 0 }
 0x313   : > { %v615_v31 = vpop.permute.xlu1 %614 }
 0x314   : > { %1106 = vmatmul.mubr.msk.bf16.vlgmr.msra.gmra.mrb[0].mxu1 %vm382_vm2, %v1740_v25  ;;  %v620_v34 = vsel %vm382_vm2, %v615_v31, 0 }
 0x315   : > { %1116 = vmatpush3.bf16.xpose.msra.mxu1 %v501_v30  ;;  %1117 = vmatprep.mubr.msk.bf16.mxu1 %vm1473_vm1, %v1472_v8 }
 0x316   : > { %1127 = vmatprep.subr.bf16.mxu1 %v1472_v8 }
 0x317   : > { %v613_v33 = vpop.permute.xlu1 %612 }
 0x31b   : > { %v734_v35 = vpop.permute.xlu1 %733 }
 0x31c   : > { %1118 = vmatmul.mubr.msk.bf16.vlgmr.msra.gmra.mrb[4].mxu1 %vm382_vm2, %v494_v32  ;;  %v739_v36 = vsel %vm382_vm2, %v734_v35, 0 }
 0x31d   : > { %1128 = vmatpush3.bf16.xpose.msra.mxu1 %v620_v34  ;;  %1129 = vmatprep.mubr.msk.bf16.mxu1 %vm1473_vm1, %v1472_v8 }
 0x31e   : > { %1139 = vmatprep.subr.bf16.mxu1 %v1472_v8 }
 0x31f   : > { %v732_v37 = vpop.permute.xlu1 %731 }
 0x324   : > { %1130 = vmatmul.mubr.msk.bf16.vlgmr.msra.gmra.mrb[8].mxu1 %vm382_vm2, %v613_v33 }
 0x325   : > { %1140 = vmatpush3.bf16.xpose.msra.mxu1 %v739_v36  ;;  %1141 = vmatprep.mubr.msk.bf16.mxu1 %vm1473_vm1, %v1472_v8 }
 0x326   : > { %1151 = vmatprep.subr.bf16.mxu1 %v1472_v8 }
 0x32c   : > { %1142 = vmatmul.mubr.msk.bf16.vlgmr.msra.gmra.mrb[12].mxu1 %vm382_vm2, %v732_v37 }
 0x32d   : > { %1155 = vmatprep.mubr.msk.bf16.mxu1 %vm1473_vm1, %v1472_v8 }
 0x3e7   : > { %v423_v38 = vpop.f32.mrb[0].mxu1 }
 0x3e8   : > { %v1107_v39 = vpop.f32.mrb[1].mxu1  ;;  %v429_v40 = vsel %vm382_vm2, %v423_v38, -inf }
 0x3e9   : > { %430 = vmax.xlane.f32.xlu1 %v429_v40  ;;  %v426_v41 = vpop.f32.mrb[2].mxu1 }
 0x3ea   : > { %v1108_v42 = vpop.f32.mrb[3].mxu1 }
 0x3ef   : > { %v537_v43 = vpop.f32.mrb[4].mxu1 }
 0x3f0   : > { %v1119_v44 = vpop.f32.mrb[5].mxu1  ;;  %v543_v45 = vsel %vm382_vm2, %v537_v43, -inf }
 0x3f1   : > { %544 = vmax.xlane.f32.xlu0 %v543_v45  ;;  %v540_v46 = vpop.f32.mrb[6].mxu1 }
 0x3f2   : > { %v1120_v47 = vpop.f32.mrb[7].mxu1 }
 0x3f7   : > { %v656_v48 = vpop.f32.mrb[8].mxu1 }
 0x3f8   : > { %v1131_v49 = vpop.f32.mrb[9].mxu1  ;;  %v662_v57 = vsel %vm382_vm2, %v656_v48, -inf }
 0x3f9   : > { %v659_v50 = vpop.f32.mrb[10].mxu1 }
 0x3fa   : > { %439 = vrot.lane.b32.xlu1 %v1740_v25, %s1481_s15  ;;  %v1132_v51 = vpop.f32.mrb[11].mxu1  ;;  %s1394_s15 = sshll.u32 %s1488_s29, 4  ;;  %s1395_s15 = int_to_ptr.vmem [resolvable:$false] %s1394_s15 }
 0x3fb   : > { %p1397_p3 = scmp.lt.s32.totalorder %s1810_s12, %s1395_s15 }
 0x3ff   : > { %v775_v52 = vpop.f32.mrb[12].mxu1 }
 0x400   : > { %v1143_v53 = vpop.f32.mrb[13].mxu1  ;;  %v781_v54 = vsel %vm382_vm2, %v775_v52, -inf }
 0x401   : > { %782 = vmax.xlane.f32.xlu0 %v781_v54  ;;  %v778_v55 = vpop.f32.mrb[14].mxu1 }
 0x402   : > { %v1144_v56 = vpop.f32.mrb[15].mxu1 }
 0x417   : > { %553 = vrot.lane.b32.xlu0 %v1740_v25, %s1482_s16  ;;  %s1396_s16 = scalar_lea.vmem %s1395_s15, 256 }
 0x418   : > { %p1398_p7 = scmp.lt.s32.totalorder %s1396_s16, %s1390_s28 }
 0x41a   : > { %p1399_p10 = por %p1398_p7, %p1397_p3 }
 0x41c   : > { %p1400_p13 = pnand %p1399_p10, %p1393_p8 }
 0x41e   : > { %663 = vmax.xlane.f32.xlu1 %v662_v57 }
 0x42f   : > { %672 = vrot.lane.b32.xlu1 %v1740_v25, %s1483_s10 }
 0x433   : > { %791 = vrot.lane.b32.xlu1 %v1740_v25, %s1484_s17 }
 0x476   : > { %v431_v58 = vpop.xlane.xlu1 %430 }
 0x477   : > { %v432_v59 = vsub.f32 %v423_v38, %v431_v58 }
 0x479   : > { %v433_v60 = vmul.f32 1.442695, %v432_v59 }
 0x47a   : > { %v440_v61 = vpop.permute.xlu1 %439 }
 0x47b   : > { %1260 = vpow2.f32 %v433_v60  ;;  %v446_v62 = vsel %vm444_vm3, %v440_v61, 0 }
 0x47c   : > { %1110 = vmatpush3.bf16.msra.mxu0 %v446_v62 }
 0x47d   : > { %1121 = vmatprep.subr.bf16.mxu0 %v1472_v8 }
 0x47e   : > { %v545_v63 = vpop.xlane.xlu0 %544 }
 0x47f   : > { %v546_v1 = vsub.f32 %v537_v43, %v545_v63 }
 0x481   : > { %v547_v2 = vmul.f32 1.442695, %v546_v1 }
 0x483   : > { %1262 = vpow2.f32 %v547_v2  ;;  %v1062_v2 = vld [vmem:[#allocation6 + $0x2] ss:$0 sm:$0xff] }
 0x485   : > { %v1261_v3 = vpop.eup %1260 }
 0x486   : > { %v438_v4 = vpack.c.bf16 %v1261_v3, %v1261_v3  ;;  %v435_v16 = vsel %vm382_vm2, %v1261_v3, 0.0 }
 0x488   : > { %1112 = vmatmul.mubr.msk.bf16.vlgmr.msra.gmra.mrb[4].mxu0 %vm382_vm2, %v438_v4 }
 0x489   : > { %1123 = vmatprep.mubr.msk.bf16.mxu0 %vm1473_vm1, %v1472_v8 }
 0x48d   : > { %v1263_v5 = vpop.eup %1262 }
 0x48e   : > { %v783_v6 = vpop.xlane.xlu0 %782  ;;  %v549_v7 = vsel %vm382_vm2, %v1263_v5, 0.0  ;;  %v552_v13 = vpack.c.bf16 %v1263_v5, %v1263_v5 }
 0x48f   : > { %v784_v9 = vsub.f32 %v775_v52, %v783_v6  ;;  %550 = vadd.xlane.f32.xlu0 %v549_v7  ;;  %v1257_v52 = vld [vmem:[#allocation9 + $0x8] sm:$0xff]  }
 0x491   : > { %v785_v10 = vmul.f32 1.442695, %v784_v9 }
 0x492   : > { %v554_v11 = vpop.permute.xlu0 %553 }
 0x493   : > { %1264 = vpow2.f32 %v785_v10  ;;  %v559_v12 = vsel %vm444_vm3, %v554_v11, 0 }
 0x494   : > { %1122 = vmatpush3.bf16.msra.mxu0 %v559_v12 }
 0x495   : > { %1133 = vmatprep.subr.bf16.mxu0 %v1472_v8 }
 0x497   : > { %1124 = vmatmul.mubr.msk.bf16.vlgmr.msra.gmra.mrb[8].mxu0 %vm382_vm2, %v552_v13 }
 0x498   : > { %1135 = vmatprep.mubr.msk.bf16.mxu0 %vm1473_vm1, %v1472_v8 }
 0x49d   : > { %v1265_v14 = vpop.eup %1264 }
 0x49e   : > { %v787_v15 = vsel %vm382_vm2, %v1265_v14, 0.0  ;;  %v790_v27 = vpack.c.bf16 %v1265_v14, %v1265_v14 }
 0x49f   : > { %788 = vadd.xlane.f32.xlu0 %v787_v15 }
 0x4a3   : > { %436 = vadd.xlane.f32.xlu0 %v435_v16 }
 0x4ab   : > { %v664_v17 = vpop.xlane.xlu1 %663 }
 0x4ac   : > { %v665_v18 = vsub.f32 %v656_v48, %v664_v17  ;;  %v1256_v48 = vld [vmem:[#allocation9] sm:$0xff]  }
 0x4ad   : > { %1152 = vmatpush3.bf16.msra.mxu1 %v1256_v48 }
 0x4ae   : > { %v666_v19 = vmul.f32 1.442695, %v665_v18  ;;  %1153 = vmatprep.subr.bf16.mxu1 %v1472_v8 }
 0x4af   : > { %v673_v20 = vpop.permute.xlu1 %672 }
 0x4b0   : > { %1266 = vpow2.f32 %v666_v19  ;;  %v678_v21 = vsel %vm444_vm3, %v673_v20, 0 }
 0x4b1   : > { %1134 = vmatpush3.bf16.msra.mxu0 %v678_v21  ;;  %1154 = vmatpush3.bf16.msra.mxu1 %v1257_v52 }
 0x4b2   : > { %1145 = vmatprep.subr.bf16.mxu0 %v1472_v8 }
 0x4b3   : > { %v792_v23 = vpop.permute.xlu1 %791 }
 0x4b4   : > { %v797_v26 = vsel %vm444_vm3, %v792_v23, 0 }
 0x4ba   : > { %v1267_v22 = vpop.eup %1266 }
 0x4bb   : > { %v668_v24 = vsel %vm382_vm2, %v1267_v22, 0.0  ;;  %v671_v25 = vpack.c.bf16 %v1267_v22, %v1267_v22 }
 0x4bc   : > { %669 = vadd.xlane.f32.xlu1 %v668_v24 }
 0x4bd   : > { %1136 = vmatmul.mubr.msk.bf16.vlgmr.msra.gmra.mrb[12].mxu0 %vm382_vm2, %v671_v25 }
 0x4be   : > { %1146 = vmatpush3.bf16.msra.mxu0 %v797_v26  ;;  %1147 = vmatprep.mubr.msk.bf16.mxu0 %vm1473_vm1, %v1472_v8 }
 0x4c5   : > { %1148 = vmatmul.mubr.msk.bf16.vlgmr.msra.gmra.mrb[16].mxu0 %vm382_vm2, %v790_v27 }
 0x51c   : > { %v551_v28 = vpop.xlane.xlu0 %550 }
 0x52c   : > { %v789_v29 = vpop.xlane.xlu0 %788 }
 0x530   : > { %v437_v30 = vpop.xlane.xlu0 %436 }
 0x531   : > { %1268 = vrcp.f32 %v437_v30 }
 0x532   : > { %1270 = vrcp.f32 %v551_v28 }
 0x53b   : > { %v1269_v31 = vpop.eup %1268 }
 0x53c   : > { %v1271_v38 = vpop.eup %1270 }
 0x549   : > { %v670_v45 = vpop.xlane.xlu1 %669 }
 0x54a   : > { %1272 = vrcp.f32 %v670_v45 }
 0x54b   : > { %1274 = vrcp.f32 %v789_v29 }
 0x554   : > { %v1273_v46 = vpop.eup %1272 }
 0x555   : > { %v1275_v55 = vpop.eup %1274 }
 0x55b   : > { %v482_v32 = vpop.f32.mrb[4].mxu0 }
 0x55c   : > { %v489_v33 = vmul.f32 %v1269_v31, %v482_v32  ;;  %v1113_v34 = vpop.f32.mrb[5].mxu0 }
 0x55d   : > { %v485_v35 = vpop.f32.mrb[6].mxu0 }
 0x55e   : > { %v490_v36 = vpack.c.bf16 %v489_v33, %v489_v33  ;;  %v1114_v37 = vpop.f32.mrb[7].mxu0 }
 0x560   : > { %492 = vst.msk [vmem:[#allocation2] sm:$0xf] %vm491_vm4, %v490_v36 }
 0x56a   : > { %v595_v39 = vpop.f32.mrb[8].mxu0 }
 0x56b   : > { %v602_v40 = vmul.f32 %v1271_v38, %v595_v39  ;;  %v1125_v41 = vpop.f32.mrb[9].mxu0 }
 0x56c   : > { %v598_v42 = vpop.f32.mrb[10].mxu0 }
 0x56d   : > { %v1070_v43 = vpack.c.bf16 %v602_v40, %v602_v40  ;;  %v1126_v44 = vpop.f32.mrb[11].mxu0 }
 0x56f   : > { %607 = vrot.lane.b32.xlu1 %v1070_v43, %s1485_s6 }
 0x590   : > { %v714_v47 = vpop.f32.mrb[12].mxu0 }
 0x591   : > { %v721_v49 = vmul.f32 %v1273_v46, %v714_v47  ;;  %v1137_v50 = vpop.f32.mrb[13].mxu0 }
 0x592   : > { %v717_v51 = vpop.f32.mrb[14].mxu0 }
 0x593   : > { %v1071_v53 = vpack.c.bf16 %v721_v49, %v721_v49  ;;  %v1138_v54 = vpop.f32.mrb[15].mxu0 }
 0x595   : > { %726 = vrot.lane.b32.xlu0 %v1071_v53, %s1486_s24 }
 0x598   : > { %v833_v56 = vpop.f32.mrb[16].mxu0 }
 0x599   : > { %v840_v57 = vmul.f32 %v1275_v55, %v833_v56  ;;  %v1149_v58 = vpop.f32.mrb[17].mxu0 }
 0x59a   : > { %v836_v59 = vpop.f32.mrb[18].mxu0 }
 0x59b   : > { %v1072_v60 = vpack.c.bf16 %v840_v57, %v840_v57  ;;  %v1150_v61 = vpop.f32.mrb[19].mxu0 }
 0x59d   : > { %845 = vrot.lane.b32.xlu1 %v1072_v60, %s1487_s26 }
 0x5e1   : > { %v608_v62 = vpop.permute.xlu1 %607 }
 0x5e2   : > { %611 = vst.msk [vmem:[#allocation2] sm:$0xf] %vm610_vm5, %v608_v62 }
 0x607   : > { %v727_v63 = vpop.permute.xlu0 %726 }
 0x608   : > { %730 = vst.msk [vmem:[#allocation2] sm:$0xf] %vm729_vm6, %v727_v63 }
 0x60f   : > { %v846_v8 = vpop.permute.xlu1 %845 }
 0x610   : > { %849 = vst.msk [vmem:[#allocation2] sm:$0xf] %vm848_vm7, %v846_v8 }
 0x617   : > { %v850_v1 = vld [vmem:[#allocation2] sm:$0xf] }
 0x618   : > { %1156 = vmatmul.mubr.msk.bf16.vlgmr.msra.gmra.mrb[16].mxu1 %vm286_vm0, %v850_v1 }
 0x6eb   : > { %v909_v3 = vpop.f32.mrb[16].mxu1 }
 0x6ec   : > { %v910_v4 = vadd.f32 %v1062_v2, %v909_v3  ;;  %v1157_v5 = vpop.f32.mrb[17].mxu1 }
 0x6ed   : > { %v912_v6 = vpop.f32.mrb[18].mxu1 }
 0x6ee   : > { %v916_v7 = vadd.f32 %v910_v4, %v1720_v0  ;;  %v1158_v9 = vpop.f32.mrb[19].mxu1 }
 0x6f0   : > { %917 = vst.msk [vmem:[%s281_s11] sm:$0xff] %vm286_vm0, %v916_v7 }
 0x6f1   : > { %1403 = shalt.err (!%p1400_p13)
}
 0x6f2   : > { %s1404_s30 = scalar_lea.hbm %s1808_s8, 128  ;;  %s1408_s6 = scalar_lea.hbm %s1858_s5, 256 }
 0x6f3   : > { %p1405_p5 = scmp.ne.s32.totalorder %s1808_s8, %s1404_s30  ;;  %p1409_p9 = scmp.lt.u32.totalorder %s1808_s8, %s1858_s5 }
 0x6f4   : > { %p1410_p12 = scmp.lt.u32.totalorder %s1408_s6, %s1404_s30  ;;  %p1412_p1 = scmp.lt.u32.totalorder %s1404_s30, %s1808_s8 }
 0x6f5   : > { %p1406_p0 = pnand %p1405_p5, %p1657_p6 }
 0x6f6   : > { %p1411_p2 = por %p1410_p12, %p1409_p9 }
 0x6f7   : > { %p1407_p11 = pneg %p1406_p0 }
 0x6f8   : > { %p1413_p4 = por %p1412_p1, %p1411_p2 }
 0x6fa   : > { %p1414_p8 = pnand %p1413_p4, %p1407_p11 }
 0x6fc   : > { %1417 = shalt.err (!%p1414_p8)
}
 0x6fd   : > { %1173 = dma.vmem_to_hbm [thread:$0]  (%p1657_p6), %s1810_s12, 128, %s1808_s8, %s919_s22  }
 0x6fe PF: > { %s944_s9 = sand.u32 1, %s1452_s18   ;;  %p1876_p3 = scmp.ne.s32.totalorder %s1863_s25, 0 }
 0x6ff   : > { %p1877_p7 = scmp.ge.s32.totalorder %s1464_s21, 2  ;;  %s945_s11 = scalar_lea.sflag [#allocation5], %s944_s9 }
 0x701   : > { %p1190_p10 = pnand %p1877_p7, %p1876_p3 }
 0x703   : > { %1447 = dma.done.wait (!%p1190_p10), %s945_s11, 128  }
 0x704   : > { %1449 = vsyncadd (!%p1190_p10), %s945_s11, 4294967168  ;;  %p20_p13 = scmp.ge.s32.totalorder %s1643_s14, 4   ;;  %s1878_s18 = smov %s1456_s19 }
 0x705   : > { %s1879_s19 = smov %s1460_s20  ;;  %s1880_s20 = smov %s1653_s23 }
 0x706   : > { %s1881_s21 = smov %s1643_s14  ;;  %22 = sbr.rel (!%p20_p13) target bundleno = 7 (0x7), region = 97 }
 0x70d   :  { %950 = vsyncpa [#allocation4], 1 }
 0x70e   :  { %952 = vsyncpa [#allocation4 + $0x1], 1 }
 0x70f   :  { %953 = vsyncpa [#allocation7], 1 }
 0x710   :  { %954 = vsyncpa [#allocation10], 1 }
 0x711   :  { %955 = vsyncpa [#allocation5], 1 }
 0x712   :  { %957 = vsyncpa [#allocation5 + $0x1], 1 }

</bundles_post_ra>
